<compile_context>
chip_gen: v5e
topology: v5e:2x2
jax: 0.10.0
libtpu: 0.0.40
codegen_flags: <defaults>
</compile_context>

<pallas_src>
import functools

import jax
import jax.numpy as jnp
import numpy as np
from jax.experimental import pallas as pl
from jax.experimental.pallas import tpu as pltpu

_HI = jax.lax.Precision.HIGHEST


# ----------------------------- Pallas kernel --------------------------------
def node_encoder_kernel(x_ref, eid_ref, ew_ref, p_ref, out_ref,
                        *, n_nodes, feat, n_layers):
    N, F, T = n_nodes, feat, n_layers
    F2 = 2 * F
    N2 = 2 * N

    def lrelu(v):  # leaky_relu, negative_slope = 0.2
        return jnp.where(v >= 0.0, v, 0.2 * v)

    def mm(a, b):
        return jnp.dot(a, b, precision=_HI, preferred_element_type=jnp.float32)

    x = x_ref[...]                                            # [N, 2F]

    # -- stack the two streams: rows <N = stream 1 (x1, live lanes F..2F-1),
    #    rows >=N = stream 2 (x2, live lanes 0..F-1).  Dead quadrants start 0.
    lane = jax.lax.broadcasted_iota(jnp.int32, (N, F2), 1)
    X = jnp.concatenate([jnp.where(lane >= F, x, 0.0),        # [0  | x1]
                         jnp.where(lane < F, x, 0.0)],        # [x2 | 0 ]
                        axis=0)                               # [2N, 2F]

    # -- block-diagonal adjacency A = blockdiag(a1, a2) built from the edge
    #    list: A[r, c] = sum_e w_e * [row_e == r] * [col_e == c]
    E2 = eid_ref.shape[1]
    vrow = eid_ref[0:1, :]                                    # [1, 2E] int32
    vcol = eid_ref[1:2, :]
    w = ew_ref[...]                                           # [1, 2E] f32
    rid = jax.lax.broadcasted_iota(jnp.int32, (N2, E2), 0)
    R = jnp.where(rid == vrow, w, 0.0)                        # weighted row one-hots
    C = (rid == vcol).astype(jnp.float32)                     # col one-hots
    A = jax.lax.dot_general(R, C, (((1,), (1,)), ((), ())),
                            precision=_HI,
                            preferred_element_type=jnp.float32)   # [2N, 2N]
    ri = jax.lax.broadcasted_iota(jnp.int32, (N2, N2), 0)
    ci = jax.lax.broadcasted_iota(jnp.int32, (N2, N2), 1)
    A_sl = A + (ri == ci).astype(jnp.float32)                 # + I (self loops, w=1.0)

    # -- T fused GCN layers: both streams share each matmul --------------------
    V0 = (T + 2) * F2                                         # vector region base
    for i in range(T):
        Wb = p_ref[i * F2:(i + 1) * F2, :]                    # blockdiag(wc2_t, wc1_t)
        b = p_ref[V0 + 8 * i:V0 + 8 * i + 1, :]               # [bc2 | bc1]
        H = mm(X, Wb) + b
        Ai = A if i == 0 else A_sl                            # self loops only for i>0
        X = lrelu(mm(Ai, H))

    # -- head: zero dead quadrants, w1/w2 projection, fc1, fc2 -----------------
    rI = jax.lax.broadcasted_iota(jnp.int32, (N2, F2), 0)
    cI = jax.lax.broadcasted_iota(jnp.int32, (N2, F2), 1)
    live = (rI < N) != (cI < F)                               # live quadrants only
    Xl = jnp.where(live, X, 0.0)

    Whead = p_ref[T * F2:(T + 1) * F2, :]                     # blockdiag(w2_t, w1_t)
    Z = mm(Xl, Whead)                                         # [[0|z1],[z2|0]]
    zc = Z[:N, :] + Z[N:, :]                                  # [N, 2F] = [z2 | z1]

    fc1W = p_ref[(T + 1) * F2:(T + 2) * F2, :]                # row-swapped fc1.weight.T
    fc1b = p_ref[V0 + 8 * T:V0 + 8 * T + 1, :]
    y = mm(zc, fc1W) + fc1b                                   # [N, 2F]

    fc2w = p_ref[V0 + 8 * (T + 1):V0 + 8 * (T + 1) + 1, :]    # [1, 2F]
    fc2b = p_ref[V0 + 8 * (T + 2):V0 + 8 * (T + 2) + 1, 0:1]  # [1, 1]
    s = lrelu(jnp.sum(y * fc2w, axis=-1, keepdims=True) + fc2b)   # [N, 1]

    out_ref[0:N, :] = y
    out_ref[N:N2, :] = jnp.broadcast_to(s, (N, F2))           # lane-dense score slab


# ------------------------------- wrapper -------------------------------------
@functools.partial(jax.jit, static_argnames=("T",))
def node_encoder_forward(x, edge_index, edge_weight, param_slab, T):
    N, F2 = x.shape
    F = F2 // 2
    E = edge_index.shape[1]

    # Virtual edge list for the block-diagonal adjacency:
    #   top-left block  (stream 1, reversed edges): A[src, dst]       += w
    #   bottom-right    (stream 2, normal edges)  : A[dst+N, src+N]   += w
    src = edge_index[0].astype(jnp.int32)
    dst = edge_index[1].astype(jnp.int32)
    eids = jnp.stack([jnp.concatenate([src, dst + N]),
                      jnp.concatenate([dst, src + N])])           # [2, 2E] int32
    ew2 = jnp.concatenate([edge_weight, edge_weight]
                          ).astype(jnp.float32).reshape(1, 2 * E)  # [1, 2E]

    kernel = functools.partial(node_encoder_kernel,
                               n_nodes=N, feat=F, n_layers=T)
    vmem = pl.BlockSpec(memory_space=pltpu.MemorySpace.VMEM)
    out = pl.pallas_call(
        kernel,
        out_shape=jax.ShapeDtypeStruct((2 * N, F2), jnp.float32),
        in_specs=[vmem, vmem, vmem, vmem],
        out_specs=vmem,
    )(x, eids, ew2, param_slab)

    score = out[N:, 0]            # bottom half: score broadcast over lanes
    y = out[:N, :]                # top half:    y
    return score, y               # matches (x.view(-1), y)


# --------------------------- parameter creation -------------------------------
def init_params(key, num_features, T=3):
    F = num_features

    def linear(key, fan_in, fan_out, bias=True):
        kw, kb = jax.random.split(key)
        bound = 1.0 / np.sqrt(fan_in)
        W = jax.random.uniform(kw, (fan_out, fan_in), jnp.float32, -bound, bound)
        b = (jax.random.uniform(kb, (fan_out,), jnp.float32, -bound, bound)
             if bias else None)
        return W, b

    keys = jax.random.split(key, 2 * T + 4)
    wc1, bc1, wc2, bc2 = [], [], [], []
    for i in range(T):
        W, b = linear(keys[i], F, F)
        wc1.append(W.T); bc1.append(b.reshape(1, F))
        W, b = linear(keys[T + i], F, F)
        wc2.append(W.T); bc2.append(b.reshape(1, F))

    w1, _ = linear(keys[2 * T + 0], F, F, bias=False)
    w2, _ = linear(keys[2 * T + 1], F, F, bias=False)
    fc1W, fc1b = linear(keys[2 * T + 2], 2 * F, 2 * F)
    fc2W, fc2b = linear(keys[2 * T + 3], 2 * F, 1)

    fc1Wt = fc1W.T                     # [2F, 2F]
    return {
        "wc1_t": jnp.stack(wc1),       # [T, F, F]  (already transposed)
        "bc1":   jnp.stack(bc1),       # [T, 1, F]
        "wc2_t": jnp.stack(wc2),
        "bc2":   jnp.stack(bc2),
        "w1_t":  w1.T,                 # [F, F]
        "w2_t":  w2.T,
        "fc1wa_t": fc1Wt[:F, :],       # rows multiplying w1(x1)
        "fc1wb_t": fc1Wt[F:, :],       # rows multiplying w2(x2)
        "fc1b":  fc1b.reshape(1, 2 * F),
        "fc2w_t": fc2W.T,              # [2F, 1]
        "fc2b":  fc2b.reshape(1, 1),
    }


def pack_params(params, T):
    """Pack every weight/bias into one [ (T+2)*2F + 8*(T+3), 2F ] f32 slab."""
    F = params["w1_t"].shape[0]
    F2 = 2 * F
    rows = []
    # per-layer block-diagonal conv weights: [:F,:F]=wc2_t (stream 2 lanes),
    # [F:,F:]=wc1_t (stream 1 lanes)
    for i in range(T):
        Wb = (jnp.zeros((F2, F2), jnp.float32)
              .at[:F, :F].set(params["wc2_t"][i])
              .at[F:, F:].set(params["wc1_t"][i]))
        rows.append(Wb)
    # head projection blockdiag(w2_t, w1_t)
    rows.append(jnp.zeros((F2, F2), jnp.float32)
                .at[:F, :F].set(params["w2_t"])
                .at[F:, F:].set(params["w1_t"]))
    # fc1.weight.T with its row blocks swapped (kernel feeds [z2 | z1])
    rows.append(jnp.concatenate([params["fc1wb_t"], params["fc1wa_t"]], axis=0))

    def vec_block(row):                # [1, 2F] -> 8-row aligned group
        return jnp.concatenate([row, jnp.zeros((7, F2), jnp.float32)], axis=0)

    for i in range(T):                 # conv biases, [bc2 | bc1]
        rows.append(vec_block(jnp.concatenate([params["bc2"][i],
                                               params["bc1"][i]], axis=-1)))
    rows.append(vec_block(params["fc1b"]))
    rows.append(vec_block(params["fc2w_t"].reshape(1, F2)))
    rows.append(vec_block(jnp.zeros((1, F2), jnp.float32)
                          .at[0, 0].set(params["fc2b"][0, 0])))
    return jnp.concatenate(rows, axis=0)


# ------------------------------ JAX reference ---------------------------------
def reference_forward(x, edge_index, edge_weight, params):
    N = x.shape[0]
    F = x.shape[1] // 2
    x1, x2 = x[:, F:], x[:, :F]
    src, dst = edge_index[0], edge_index[1]
    a2 = jnp.zeros((N, N), jnp.float32).at[dst, src].add(edge_weight)
    a1 = jnp.zeros((N, N), jnp.float32).at[src, dst].add(edge_weight)

    def lrelu(v): return jnp.where(v >= 0.0, v, 0.2 * v)
    def dot(a, b): return jnp.dot(a, b, precision=_HI)

    T = params["wc1_t"].shape[0]
    for i in range(T):
        h1 = dot(x1, params["wc1_t"][i]) + params["bc1"][i]
        m1 = dot(a1, h1) + (h1 if i > 0 else 0.0)
        x1 = lrelu(m1)
        h2 = dot(x2, params["wc2_t"][i]) + params["bc2"][i]
        m2 = dot(a2, h2) + (h2 if i > 0 else 0.0)
        x2 = lrelu(m2)
    z1 = dot(x1, params["w1_t"])
    z2 = dot(x2, params["w2_t"])
    y = dot(z1, params["fc1wa_t"]) + dot(z2, params["fc1wb_t"]) + params["fc1b"]
    s = lrelu(dot(y, params["fc2w_t"]) + params["fc2b"])
    return s.reshape(-1), y


# ---------------------------------- main ---------------------------------------
if __name__ == "__main__":
    key = jax.random.PRNGKey(0)
    k_x, k_e, k_w, k_p = jax.random.split(key, 4)

    N = 16                 # number of nodes
    num_features = 32      # F  -> node feature dim is 2*F = 64
    E = 40                 # number of edges
    T = 3

    x = jax.random.normal(k_x, (N, 2 * num_features), jnp.float32)

    # random simple directed graph: E distinct edges, no self loops
    all_pairs = jnp.arange(N * N, dtype=jnp.int32)
    offdiag = all_pairs[(all_pairs // N) != (all_pairs % N)]
    flat = jax.random.choice(k_e, offdiag, (E,), replace=False)
    edge_index = jnp.stack([flat // N, flat % N]).astype(jnp.int32)
    edge_weight = jax.random.uniform(k_w, (E,), jnp.float32)

    params = init_params(k_p, num_features, T=T)
    param_slab = pack_params(params, T=T)

    score, y = node_encoder_forward(x, edge_index, edge_weight, param_slab, T=T)
    jax.block_until_ready((score, y))

    score_ref, y_ref = reference_forward(x, edge_index, edge_weight, params)
    assert score.shape == (N,) and y.shape == (N, 2 * num_features)
    np.testing.assert_allclose(np.asarray(score), np.asarray(score_ref),
                               rtol=1e-4, atol=1e-4)
    np.testing.assert_allclose(np.asarray(y), np.asarray(y_ref),
                               rtol=1e-4, atol=1e-4)
    print("KERNEL_OK")
</pallas_src>

<mosaic_0001>
module attributes {stable_mosaic.version = 11 : i64} {
  func.func @node_encoder_kernel(%arg0: memref<16x64xf32, #tpu.memory_space<vmem>>, %arg1: memref<2x80xi32, #tpu.memory_space<vmem>>, %arg2: memref<1x80xf32, #tpu.memory_space<vmem>>, %arg3: memref<368x64xf32, #tpu.memory_space<vmem>>, %arg4: memref<32x64xf32, #tpu.memory_space<vmem>>) attributes {dimension_semantics = [], scalar_prefetch = 0 : i64, scratch_operands = 0 : i64, tpu.core_type = #tpu.core_type<tc>} {
    %c0 = arith.constant 0 : index
    %c0_0 = arith.constant 0 : index
    %0 = vector.load %arg0[%c0, %c0_0] : memref<16x64xf32, #tpu.memory_space<vmem>>, vector<16x64xf32>
    %1 = tpu.iota {dimensions = array<i32: 1>} : vector<16x64xi32>
    %c32_i32 = arith.constant 32 : i32
    %2 = vector.broadcast %c32_i32 : i32 to vector<16x64xi32>
    %3 = arith.cmpi sge, %1, %2 : vector<16x64xi32>
    %cst = arith.constant 0.000000e+00 : f32
    %4 = vector.broadcast %cst : f32 to vector<16x64xf32>
    %5 = arith.select %3, %0, %4 : vector<16x64xi1>, vector<16x64xf32>
    %c32_i32_1 = arith.constant 32 : i32
    %6 = vector.broadcast %c32_i32_1 : i32 to vector<16x64xi32>
    %7 = arith.cmpi slt, %1, %6 : vector<16x64xi32>
    %cst_2 = arith.constant 0.000000e+00 : f32
    %8 = vector.broadcast %cst_2 : f32 to vector<16x64xf32>
    %9 = arith.select %7, %0, %8 : vector<16x64xi1>, vector<16x64xf32>
    %10 = tpu.concatenate %5, %9 in 0 : vector<16x64xf32>, vector<16x64xf32> -> vector<32x64xf32>
    %c0_3 = arith.constant 0 : index
    %c0_4 = arith.constant 0 : index
    %11 = vector.load %arg1[%c0_3, %c0_4] : memref<2x80xi32, #tpu.memory_space<vmem>>, vector<1x80xi32>
    %c1 = arith.constant 1 : index
    %c0_5 = arith.constant 0 : index
    %12 = vector.load %arg1[%c1, %c0_5] : memref<2x80xi32, #tpu.memory_space<vmem>>, vector<1x80xi32>
    %c0_6 = arith.constant 0 : index
    %c0_7 = arith.constant 0 : index
    %13 = vector.load %arg2[%c0_6, %c0_7] : memref<1x80xf32, #tpu.memory_space<vmem>>, vector<1x80xf32>
    %14 = tpu.iota {dimensions = array<i32: 0>} : vector<32x80xi32>
    %15 = vector.broadcast %11 : vector<1x80xi32> to vector<32x80xi32>
    %16 = arith.cmpi eq, %14, %15 : vector<32x80xi32>
    %cst_8 = arith.constant 0.000000e+00 : f32
    %17 = vector.shape_cast %13 : vector<1x80xf32> to vector<1x80xf32>
    %18 = vector.broadcast %17 : vector<1x80xf32> to vector<32x80xf32>
    %19 = vector.broadcast %cst_8 : f32 to vector<32x80xf32>
    %20 = arith.select %16, %18, %19 : vector<32x80xi1>, vector<32x80xf32>
    %21 = vector.broadcast %12 : vector<1x80xi32> to vector<32x80xi32>
    %22 = arith.cmpi eq, %14, %21 : vector<32x80xi32>
    %23 = arith.extui %22 : vector<32x80xi1> to vector<32x80xi32>
    %24 = arith.sitofp %23 : vector<32x80xi32> to vector<32x80xf32>
    %cst_9 = arith.constant dense<0.000000e+00> : vector<32x32xf32>
    %25 = tpu.matmul %20, %24, %cst_9 {dimension_numbers = #tpu.dot_dimension_numbers<[1], [1], [0], [0], [0, 0, 1, 0], [], []>, precision = #tpu.contract_precision<fp32>} : vector<32x80xf32>, vector<32x80xf32>, vector<32x32xf32> -> vector<32x32xf32>
    %26 = tpu.iota {dimensions = array<i32: 0>} : vector<32x32xi32>
    %27 = tpu.iota {dimensions = array<i32: 1>} : vector<32x32xi32>
    %28 = arith.cmpi eq, %26, %27 : vector<32x32xi32>
    %29 = arith.extui %28 : vector<32x32xi1> to vector<32x32xi32>
    %30 = arith.sitofp %29 : vector<32x32xi32> to vector<32x32xf32>
    %31 = arith.addf %25, %30 : vector<32x32xf32>
    %c0_10 = arith.constant 0 : index
    %c0_11 = arith.constant 0 : index
    %32 = vector.load %arg3[%c0_10, %c0_11] : memref<368x64xf32, #tpu.memory_space<vmem>>, vector<64x64xf32>
    %c320 = arith.constant 320 : index
    %c0_12 = arith.constant 0 : index
    %33 = vector.load %arg3[%c320, %c0_12] : memref<368x64xf32, #tpu.memory_space<vmem>>, vector<1x64xf32>
    %cst_13 = arith.constant dense<0.000000e+00> : vector<32x64xf32>
    %34 = tpu.matmul %10, %32, %cst_13 {dimension_numbers = #tpu.dot_dimension_numbers<[1], [0], [0], [1], [0, 0, 1, 1], [], []>, precision = #tpu.contract_precision<fp32>} : vector<32x64xf32>, vector<64x64xf32>, vector<32x64xf32> -> vector<32x64xf32>
    %35 = vector.broadcast %33 : vector<1x64xf32> to vector<32x64xf32>
    %36 = arith.addf %34, %35 : vector<32x64xf32>
    %cst_14 = arith.constant dense<0.000000e+00> : vector<32x64xf32>
    %37 = tpu.matmul %25, %36, %cst_14 {dimension_numbers = #tpu.dot_dimension_numbers<[1], [0], [0], [1], [0, 0, 1, 1], [], []>, precision = #tpu.contract_precision<fp32>} : vector<32x32xf32>, vector<32x64xf32>, vector<32x64xf32> -> vector<32x64xf32>
    %cst_15 = arith.constant 0.000000e+00 : f32
    %38 = vector.broadcast %cst_15 : f32 to vector<32x64xf32>
    %39 = arith.cmpf oge, %37, %38 : vector<32x64xf32>
    %cst_16 = arith.constant 2.000000e-01 : f32
    %40 = vector.broadcast %cst_16 : f32 to vector<32x64xf32>
    %41 = arith.mulf %40, %37 : vector<32x64xf32>
    %42 = arith.select %39, %37, %41 : vector<32x64xi1>, vector<32x64xf32>
    %c64 = arith.constant 64 : index
    %c0_17 = arith.constant 0 : index
    %43 = vector.load %arg3[%c64, %c0_17] : memref<368x64xf32, #tpu.memory_space<vmem>>, vector<64x64xf32>
    %c328 = arith.constant 328 : index
    %c0_18 = arith.constant 0 : index
    %44 = vector.load %arg3[%c328, %c0_18] : memref<368x64xf32, #tpu.memory_space<vmem>>, vector<1x64xf32>
    %cst_19 = arith.constant dense<0.000000e+00> : vector<32x64xf32>
    %45 = tpu.matmul %42, %43, %cst_19 {dimension_numbers = #tpu.dot_dimension_numbers<[1], [0], [0], [1], [0, 0, 1, 1], [], []>, precision = #tpu.contract_precision<fp32>} : vector<32x64xf32>, vector<64x64xf32>, vector<32x64xf32> -> vector<32x64xf32>
    %46 = vector.broadcast %44 : vector<1x64xf32> to vector<32x64xf32>
    %47 = arith.addf %45, %46 : vector<32x64xf32>
    %cst_20 = arith.constant dense<0.000000e+00> : vector<32x64xf32>
    %48 = tpu.matmul %31, %47, %cst_20 {dimension_numbers = #tpu.dot_dimension_numbers<[1], [0], [0], [1], [0, 0, 1, 1], [], []>, precision = #tpu.contract_precision<fp32>} : vector<32x32xf32>, vector<32x64xf32>, vector<32x64xf32> -> vector<32x64xf32>
    %cst_21 = arith.constant 0.000000e+00 : f32
    %49 = vector.broadcast %cst_21 : f32 to vector<32x64xf32>
    %50 = arith.cmpf oge, %48, %49 : vector<32x64xf32>
    %cst_22 = arith.constant 2.000000e-01 : f32
    %51 = vector.broadcast %cst_22 : f32 to vector<32x64xf32>
    %52 = arith.mulf %51, %48 : vector<32x64xf32>
    %53 = arith.select %50, %48, %52 : vector<32x64xi1>, vector<32x64xf32>
    %c128 = arith.constant 128 : index
    %c0_23 = arith.constant 0 : index
    %54 = vector.load %arg3[%c128, %c0_23] : memref<368x64xf32, #tpu.memory_space<vmem>>, vector<64x64xf32>
    %c336 = arith.constant 336 : index
    %c0_24 = arith.constant 0 : index
    %55 = vector.load %arg3[%c336, %c0_24] : memref<368x64xf32, #tpu.memory_space<vmem>>, vector<1x64xf32>
    %cst_25 = arith.constant dense<0.000000e+00> : vector<32x64xf32>
    %56 = tpu.matmul %53, %54, %cst_25 {dimension_numbers = #tpu.dot_dimension_numbers<[1], [0], [0], [1], [0, 0, 1, 1], [], []>, precision = #tpu.contract_precision<fp32>} : vector<32x64xf32>, vector<64x64xf32>, vector<32x64xf32> -> vector<32x64xf32>
    %57 = vector.broadcast %55 : vector<1x64xf32> to vector<32x64xf32>
    %58 = arith.addf %56, %57 : vector<32x64xf32>
    %cst_26 = arith.constant dense<0.000000e+00> : vector<32x64xf32>
    %59 = tpu.matmul %31, %58, %cst_26 {dimension_numbers = #tpu.dot_dimension_numbers<[1], [0], [0], [1], [0, 0, 1, 1], [], []>, precision = #tpu.contract_precision<fp32>} : vector<32x32xf32>, vector<32x64xf32>, vector<32x64xf32> -> vector<32x64xf32>
    %cst_27 = arith.constant 0.000000e+00 : f32
    %60 = vector.broadcast %cst_27 : f32 to vector<32x64xf32>
    %61 = arith.cmpf oge, %59, %60 : vector<32x64xf32>
    %cst_28 = arith.constant 2.000000e-01 : f32
    %62 = vector.broadcast %cst_28 : f32 to vector<32x64xf32>
    %63 = arith.mulf %62, %59 : vector<32x64xf32>
    %64 = arith.select %61, %59, %63 : vector<32x64xi1>, vector<32x64xf32>
    %65 = tpu.iota {dimensions = array<i32: 0>} : vector<32x64xi32>
    %66 = tpu.iota {dimensions = array<i32: 1>} : vector<32x64xi32>
    %c16_i32 = arith.constant 16 : i32
    %67 = vector.broadcast %c16_i32 : i32 to vector<32x64xi32>
    %68 = arith.cmpi slt, %65, %67 : vector<32x64xi32>
    %c32_i32_29 = arith.constant 32 : i32
    %69 = vector.broadcast %c32_i32_29 : i32 to vector<32x64xi32>
    %70 = arith.cmpi slt, %66, %69 : vector<32x64xi32>
    %71 = arith.xori %68, %70 : vector<32x64xi1>
    %cst_30 = arith.constant 0.000000e+00 : f32
    %72 = vector.broadcast %cst_30 : f32 to vector<32x64xf32>
    %73 = arith.select %71, %64, %72 : vector<32x64xi1>, vector<32x64xf32>
    %c192 = arith.constant 192 : index
    %c0_31 = arith.constant 0 : index
    %74 = vector.load %arg3[%c192, %c0_31] : memref<368x64xf32, #tpu.memory_space<vmem>>, vector<64x64xf32>
    %cst_32 = arith.constant dense<0.000000e+00> : vector<32x64xf32>
    %75 = tpu.matmul %73, %74, %cst_32 {dimension_numbers = #tpu.dot_dimension_numbers<[1], [0], [0], [1], [0, 0, 1, 1], [], []>, precision = #tpu.contract_precision<fp32>} : vector<32x64xf32>, vector<64x64xf32>, vector<32x64xf32> -> vector<32x64xf32>
    %76 = vector.extract_strided_slice %75 {offsets = [0, 0], sizes = [16, 64], strides = [1, 1]} : vector<32x64xf32> to vector<16x64xf32>
    %77 = vector.extract_strided_slice %75 {offsets = [16, 0], sizes = [16, 64], strides = [1, 1]} : vector<32x64xf32> to vector<16x64xf32>
    %78 = arith.addf %76, %77 : vector<16x64xf32>
    %c256 = arith.constant 256 : index
    %c0_33 = arith.constant 0 : index
    %79 = vector.load %arg3[%c256, %c0_33] : memref<368x64xf32, #tpu.memory_space<vmem>>, vector<64x64xf32>
    %c344 = arith.constant 344 : index
    %c0_34 = arith.constant 0 : index
    %80 = vector.load %arg3[%c344, %c0_34] : memref<368x64xf32, #tpu.memory_space<vmem>>, vector<1x64xf32>
    %cst_35 = arith.constant dense<0.000000e+00> : vector<16x64xf32>
    %81 = tpu.matmul %78, %79, %cst_35 {dimension_numbers = #tpu.dot_dimension_numbers<[1], [0], [0], [1], [0, 0, 1, 1], [], []>, precision = #tpu.contract_precision<fp32>} : vector<16x64xf32>, vector<64x64xf32>, vector<16x64xf32> -> vector<16x64xf32>
    %82 = vector.broadcast %80 : vector<1x64xf32> to vector<16x64xf32>
    %83 = arith.addf %81, %82 : vector<16x64xf32>
    %c352 = arith.constant 352 : index
    %c0_36 = arith.constant 0 : index
    %84 = vector.load %arg3[%c352, %c0_36] : memref<368x64xf32, #tpu.memory_space<vmem>>, vector<1x64xf32>
    %c360 = arith.constant 360 : index
    %c0_37 = arith.constant 0 : index
    %85 = vector.load %arg3[%c360, %c0_37] : memref<368x64xf32, #tpu.memory_space<vmem>>, vector<1x1xf32>
    %86 = vector.broadcast %84 : vector<1x64xf32> to vector<16x64xf32>
    %87 = arith.mulf %83, %86 : vector<16x64xf32>
    %cst_38 = arith.constant dense<0.000000e+00> : vector<16xf32>
    %88 = vector.multi_reduction <add>, %87, %cst_38 [1] : vector<16x64xf32> to vector<16xf32>
    %89 = vector.shape_cast %88 : vector<16xf32> to vector<16x1xf32>
    %90 = vector.broadcast %85 : vector<1x1xf32> to vector<16x1xf32>
    %91 = arith.addf %89, %90 : vector<16x1xf32>
    %cst_39 = arith.constant 0.000000e+00 : f32
    %92 = vector.broadcast %cst_39 : f32 to vector<16x1xf32>
    %93 = arith.cmpf oge, %91, %92 : vector<16x1xf32>
    %cst_40 = arith.constant 2.000000e-01 : f32
    %94 = vector.broadcast %cst_40 : f32 to vector<16x1xf32>
    %95 = arith.mulf %94, %91 : vector<16x1xf32>
    %96 = arith.select %93, %91, %95 : vector<16x1xi1>, vector<16x1xf32>
    %c0_41 = arith.constant 0 : index
    %c0_42 = arith.constant 0 : index
    %97 = vector.load %arg4[%c0_41, %c0_42] : memref<32x64xf32, #tpu.memory_space<vmem>>, vector<16x64xf32>
    tpu.vector_store %arg4[%c0_41, %c0_42], %83 {strides = array<i32>} : memref<32x64xf32, #tpu.memory_space<vmem>>, vector<16x64xf32>,
    %98 = vector.shape_cast %96 : vector<16x1xf32> to vector<16x1xf32>
    %99 = vector.broadcast %98 : vector<16x1xf32> to vector<16x64xf32>
    %c16 = arith.constant 16 : index
    %c0_43 = arith.constant 0 : index
    %100 = vector.load %arg4[%c16, %c0_43] : memref<32x64xf32, #tpu.memory_space<vmem>>, vector<16x64xf32>
    tpu.vector_store %arg4[%c16, %c0_43], %99 {strides = array<i32>} : memref<32x64xf32, #tpu.memory_space<vmem>>, vector<16x64xf32>,
    return
  }
}

</mosaic_0001>

<bundles_post_ra>
// kernel: node_encoder_forward.1
= control target key start
LH: loop header
LB: loop body
LE: loop exit
PB: predicated region body
PF: predicated region fallthrough
CT: control target
= control target key end

     0   :  { %v19_v0 = vlaneseq  ;;  %vm60_vm1 = vcmask 654336   ;;  %v3059_v8 = vmov 0.0   ;;  %vm389_vm10 = vcmask 523264   ;;  %s4104_s1 = inlined_call_operand.vmem [shape: s32[2,80], index: 1, kind: input, shape index: {}]   ;;  %s4105_s2 = inlined_call_operand.vmem [shape: f32[1,80], index: 2, kind: input, shape index: {}]   ;;  %s4106_s3 = inlined_call_operand.vmem [shape: f32[368,64], index: 3, kind: input, shape index: {}]   ;;  %s4107_s0 = inlined_call_operand.vmem [shape: f32[16,64], index: 0, kind: input, shape index: {}]   ;;  %s4108_s4 = inlined_call_operand.vmem [shape: f32[32,64], index: 4, kind: output, shape index: {}]  }
   0x1   :  { %v3090_v1 = vld [vmem:[%s4104_s1] ss:$0 sm:$0xff]  ;;  %v3051_v3 = vld [vmem:[%s4104_s1 + $0x1] ss:$0 sm:$0xff]  ;;  %v386_v24 = vld [vmem:[%s4106_s3 + $0x38] sm:$0xff]  ;;  %vm732_vm13 = vcmask 261120  }
   0x2   :  { %v3093_v2 = vshrl.u32 %v19_v0, 7  ;;  %v3101_v4 = vld [vmem:[%s4105_s2] ss:$0 sm:$0xff]  ;;  %v3177_v36 = vand.u32 4294901760, %v386_v24  ;;  %v385_v38 = vld [vmem:[%s4106_s3 + $0x30] sm:$0xff]  ;;  %v384_v42 = vld [vmem:[%s4106_s3 + $0x28] sm:$0xff] }
   0x3   :  { %v383_v43 = vld [vmem:[%s4106_s3 + $0x20] sm:$0xff]  ;;  %v382_v46 = vld [vmem:[%s4106_s3 + $0x18] sm:$0xff]  ;;  %v3209_v49 = vand.u32 4294901760, %v385_v38  ;;  %v3216_v53 = vand.u32 4294901760, %v384_v42  ;;  %v381_v55 = vld [vmem:[%s4106_s3 + $0x10] sm:$0xff] }
   0x4   :  { %v3104_v5 = vadd.s32 24, %v3093_v2  ;;  %v3107_v6 = vadd.s32 16, %v3093_v2  ;;  %v3110_v7 = vadd.s32 8, %v3093_v2  ;;  %vm48_vm0 = vcmp.eq.s32.totalorder %v3093_v2, %v3051_v3 }
   0x5   :  { %v3114_v9 = vsel %vm48_vm0, 1.0, %v3059_v8  ;;  %vm36_vm2 = vcmp.eq.s32.totalorder %v3093_v2, %v3090_v1  ;;  %v3212_v50 = vsub.f32 %v386_v24, %v3177_v36  ;;  %v3218_v54 = vand.u32 4294901760, %v383_v43 }
   0x6   :  { %vm51_vm3 = vcmp.eq.s32.totalorder %v3104_v5, %v3051_v3  ;;  %vm50_vm4 = vcmp.eq.s32.totalorder %v3107_v6, %v3051_v3  ;;  %vm49_vm5 = vcmp.eq.s32.totalorder %v3110_v7, %v3051_v3  ;;  %v43_v10 = vsel %vm36_vm2, %v3101_v4, 0.0 }
   0x7   :  { %v3123_v11 = vsel %vm51_vm3, 1.0, %v3059_v8  ;;  %v3126_v12 = vsel %vm50_vm4, 1.0, %v3059_v8  ;;  %v3129_v13 = vsel %vm49_vm5, 1.0, %v3059_v8  ;;  %v62_v14 = vsel %vm60_vm1, %v43_v10, 0 }
   0x8   :  { %3021 = vmatpush.xpose.msk.msra.mxu0 %vm60_vm1, %v3123_v11  ;;  %v83_v15 = vsel %vm60_vm1, %v3123_v11, 0  ;;  %3025 = vmatpush.xpose.msk.msra.mxu3 %vm60_vm1, %v3123_v11  ;;  %v80_v16 = vsel %vm60_vm1, %v3126_v12, 0  ;;  %v77_v17 = vsel %vm60_vm1, %v3129_v13, 0  ;;  %v3142_v18 = vand.u32 4294901760, %v62_v14 }
   0x9   :  { %v151_v19 = vsub.f32 %v83_v15, %v83_v15  ;;  %v3144_v20 = vsub.f32 %v80_v16, %v80_v16  ;;  %v3146_v21 = vsub.f32 %v77_v17, %v77_v17  ;;  %v74_v22 = vsel %vm60_vm1, %v3114_v9, 0 }
   0xa   :  { %v3151_v23 = vsub.f32 %v62_v14, %v3142_v18  ;;  %vm37_vm6 = vcmp.eq.s32.totalorder %v3110_v7, %v3090_v1  ;;  %vm38_vm7 = vcmp.eq.s32.totalorder %v3107_v6, %v3090_v1  ;;  %v3161_v27 = vsub.f32 %v74_v22, %v74_v22  ;;  %v379_v22 = vld [vmem:[%s4106_s3] sm:$0xff] }
   0xb   :  { %205 = vmatpush.xpose.msra.mxu2 %v151_v19  ;;  %v152_v25 = vand.u32 4294901760, %v151_v19  ;;  %v158_v26 = vand.u32 4294901760, %v3144_v20  ;;  %v44_v28 = vsel %vm37_vm6, %v3101_v4, 0.0  ;;  %v164_v30 = vand.u32 4294901760, %v3146_v21 }
   0xc   :  { %3022 = vmatpush.xpose.msk.msra.mxu0 %vm60_vm1, %v3126_v12  ;;  %3026 = vmatpush.xpose.msk.msra.mxu3 %vm60_vm1, %v3126_v12  ;;  %v107_v29 = vand.u32 4294901760, %v3151_v23  ;;  %v65_v31 = vsel %vm60_vm1, %v44_v28, 0  ;;  %v45_v32 = vsel %vm38_vm7, %v3101_v4, 0.0  ;;  %vm39_vm8 = vcmp.eq.s32.totalorder %v3104_v5, %v3090_v1  ;;  %v380_v1 = vld [vmem:[%s4106_s3 + $0x8] sm:$0xff] }
   0xd   :  { %v153_v33 = vsub.f32 %v151_v19, %v152_v25  ;;  %v159_v34 = vsub.f32 %v3144_v20, %v158_v26  ;;  %v3175_v35 = vand.u32 4294901760, %v65_v31  ;;  %v68_v37 = vsel %vm60_vm1, %v45_v32, 0 }
   0xe   :  { %v108_v40 = vsub.f32 %v3151_v23, %v107_v29  ;;  %v165_v44 = vsub.f32 %v3146_v21, %v164_v30  ;;  %v170_v45 = vand.u32 4294901760, %v3161_v27  ;;  %v3207_v48 = vand.u32 4294901760, %v68_v37 }
   0xf   :  { %v154_v39 = vand.u32 4294901760, %v153_v33  ;;  %208 = vmatpush.xpose.msra.mxu2 %v3144_v20  ;;  %v3186_v41 = vsub.f32 %v65_v31, %v3175_v35  ;;  %v160_v47 = vand.u32 4294901760, %v159_v34  ;;  %v46_v52 = vsel %vm39_vm8, %v3101_v4, 0.0 }
  0x10   :  { %3023 = vmatpush.xpose.msk.msra.mxu0 %vm60_vm1, %v3129_v13  ;;  %3027 = vmatpush.xpose.msk.msra.mxu3 %vm60_vm1, %v3129_v13  ;;  %v109_v56 = vand.u32 4294901760, %v108_v40  ;;  %v469_v57 = vand.u32 4294901760, %v3212_v50  ;;  %v3226_v58 = vsub.f32 %v385_v38, %v3209_v49  ;;  %v3228_v59 = vand.u32 4294901760, %v382_v46 }
  0x11   :  { %155 = vmatpush.xpose.msra.mxu1 %v154_v39  ;;  %v115_v51 = vand.u32 4294901760, %v3186_v41  ;;  %v166_v60 = vand.u32 4294901760, %v165_v44  ;;  %v171_v61 = vsub.f32 %v3161_v27, %v170_v45  ;;  %v3238_v62 = vsub.f32 %v384_v42, %v3216_v53 }
  0x12   :  { %v3241_v63 = vsub.f32 %v383_v43, %v3218_v54  ;;  %v71_v3 = vsel %vm60_vm1, %v46_v52, 0  ;;  %v470_v4 = vsub.f32 %v3212_v50, %v469_v57  ;;  %v475_v10 = vand.u32 4294901760, %v3226_v58 }
  0x13   :  { %211 = vmatpush.xpose.msra.mxu2 %v3146_v21  ;;  %v3251_v14 = vand.u32 4294901760, %v381_v55  ;;  %v116_v15 = vsub.f32 %v3186_v41, %v115_v51  ;;  %v3257_v16 = vsub.f32 %v68_v37, %v3207_v48  ;;  %v481_v17 = vand.u32 4294901760, %v3238_v62 }
  0x14   :  { %3024 = vmatpush.xpose.msk.msra.mxu0 %vm60_vm1, %v3114_v9  ;;  %3028 = vmatpush.xpose.msk.msra.mxu3 %vm60_vm1, %v3114_v9  ;;  %v487_v19 = vand.u32 4294901760, %v3241_v63  ;;  %v471_v24 = vand.u32 4294901760, %v470_v4  ;;  %v3269_v28 = vsub.f32 %v382_v46, %v3228_v59  ;;  %v3271_v31 = vand.u32 4294901760, %v380_v1 }
  0x15   :  { %161 = vmatpush.xpose.msra.mxu1 %v160_v47  ;;  %v172_v32 = vand.u32 4294901760, %v171_v61  ;;  %v482_v33 = vsub.f32 %v3238_v62, %v481_v17  ;;  %v3281_v38 = vsub.f32 %v381_v55, %v3251_v14  ;;  %v3283_v39 = vand.u32 4294901760, %v379_v22  ;;  %v3308_v47 = vld [vmem:[%s4107_s0] sm:$0xff] }
  0x16   :  { %v493_v37 = vand.u32 4294901760, %v3269_v28  ;;  %v123_v40 = vand.u32 4294901760, %v3257_v16  ;;  %v3287_v42 = vand.u32 4294901760, %v71_v3  ;;  %v3294_v43 = vsub.f32 %v380_v1, %v3271_v31 }
  0x17   :  { %110 = vmatmul.f32.vlgmr.msra.gmra.mxu0 %v109_v56  ;;  %214 = vmatpush.xpose.msra.mxu2 %v3161_v27  ;;  %v483_v20 = vand.u32 4294901760, %v482_v33  ;;  %v3297_v44 = vand.u32 127, %v19_v0  ;;  %v499_v46 = vand.u32 4294901760, %v3281_v38  ;;  %v3312_v0 = vsub.f32 %v379_v22, %v3283_v39 }
  0x18   :  { %296 = vmatpush.xpose.msrb.mxu0 %v152_v25  ;;  %v476_v25 = vsub.f32 %v3226_v58, %v475_v10  ;;  %259 = vmatmul.f32.vlgmr.msra.gmra.mxu3 %v107_v29  ;;  %v117_v29 = vand.u32 4294901760, %v116_v15  ;;  %v124_v21 = vsub.f32 %v3257_v16, %v123_v40  ;;  %v505_v55 = vand.u32 4294901760, %v3294_v43 }
  0x19   :  { %167 = vmatpush.xpose.msra.mxu1 %v166_v60  ;;  %472 = vmatpush.msrb.mxu3 %v471_v24  ;;  %vm21_vm9 = vcmp.ge.s32.totalorder %v3297_v44, 32  ;;  %v500_v60 = vsub.f32 %v3281_v38, %v499_v46  ;;  %v511_v61 = vand.u32 4294901760, %v3312_v0  ;;  %vm24_vm11 = vcmp.lt.s32.totalorder %v3297_v44, 32 }
  0x1a   :  { %v477_v34 = vand.u32 4294901760, %v476_v25  ;;  %217 = vmatmul.f32.vlgmr.msra.gmra.mxu2 %v3151_v23  ;;  %v494_v23 = vsub.f32 %v3269_v28, %v493_v37  ;;  %v506_v27 = vsub.f32 %v3294_v43, %v505_v55  ;;  %vm363_vm12 = vcmp.eq.s32.totalorder %v3093_v2, %v3297_v44 }
  0x1b   :  { %411 = vmatpush.msrb.mxu2 %v3177_v36  ;;  %vm364_vm14 = vcmp.eq.s32.totalorder %v3110_v7, %v3297_v44  ;;  %vm365_vm15 = vcmp.eq.s32.totalorder %v3107_v6, %v3297_v44  ;;  %vm366_vm0 = vcmp.eq.s32.totalorder %v3104_v5, %v3297_v44  ;;  %v3053_v5 = vld [vmem:[%s4106_s3 + $0x140] ss:$0 sm:$0xff] }
  0x1c   :  { %300 = vmatpush.xpose.msrb.mxu0 %v158_v26  ;;  %v488_v26 = vsub.f32 %v3241_v63, %v487_v19  ;;  %478 = vmatpush.msrb.mxu3 %v477_v34  ;;  %v495_v56 = vand.u32 4294901760, %v494_v23  ;;  %v507_v22 = vand.u32 4294901760, %v506_v27 }
  0x1d   :  { %413 = vmatpush.msrb.mxu2 %v3209_v49  ;;  %173 = vmatpush.xpose.msra.mxu1 %v172_v32 }
  0x1e   :  { %484 = vmatpush.msrb.mxu3 %v483_v20  ;;  %v489_v52 = vand.u32 4294901760, %v488_v26 }
  0x1f   :  { %415 = vmatpush.msrb.mxu2 %v3216_v53  ;;  %118 = vmatmul.f32.gmra.mxu0 %v117_v29 }
  0x20   :  { %304 = vmatpush.xpose.msrb.mxu0 %v164_v30  ;;  %v130_v30 = vsub.f32 %v71_v3, %v3287_v42  ;;  %175 = vmatmul.f32.vlgmr.msra.gmra.mxu1 %v3142_v18  ;;  %v18_v3 = vld [vmem:[%s4107_s0 + $0x8] sm:$0xff] }
  0x21   :  { %3029 = vmatpush.xpose.msk.msrb.mxu1 %vm60_vm1, %v3123_v11  ;;  %265 = vmatmul.f32.gmra.mxu3 %v115_v51  ;;  %v22_v11 = vsel %vm21_vm9, %v3308_v47, 0.0  ;;  %v125_v51 = vand.u32 4294901760, %v124_v21  ;;  %v23_v24 = vsel %vm21_vm9, %v18_v3, 0.0 }
  0x22   :  { %417 = vmatpush.msrb.mxu2 %v3218_v54  ;;  %v131_v1 = vand.u32 4294901760, %v130_v30  ;;  %490 = vmatpush.msrb.mxu3 %v489_v52  ;;  %v394_v33 = vsel %vm389_vm10, %v23_v24, 0 }
  0x23   :  { %222 = vmatmul.f32.gmra.mxu2 %v3186_v41  ;;  %v501_v41 = vand.u32 4294901760, %v500_v60  ;;  %v3373_v34 = vand.u32 4294901760, %v394_v33 }
  0x24   :  { %308 = vmatpush.xpose.msrb.mxu0 %v170_v45  ;;  %419 = vmatpush.msrb.mxu2 %v3228_v59  ;;  %v391_v45 = vsel %vm389_vm10, %v22_v11, 0  ;;  %v132_v15 = vsub.f32 %v130_v30, %v131_v1 }
  0x25   :  { %3030 = vmatpush.xpose.msk.msrb.mxu1 %vm60_vm1, %v3126_v12  ;;  %496 = vmatpush.msrb.mxu3 %v495_v56  ;;  %v512_v12 = vsub.f32 %v3312_v0, %v511_v61  ;;  %v3351_v4 = vand.u32 4294901760, %v391_v45 }
  0x26   :  { %421 = vmatpush.msrb.mxu2 %v3251_v14  ;;  %v133_v32 = vand.u32 4294901760, %v132_v15 }
  0x27   :  { %126 = vmatmul.f32.gmra.mxu0 %v125_v51  ;;  %502 = vmatpush.msrb.mxu3 %v501_v41  ;;  %v513_v25 = vand.u32 4294901760, %v512_v12  ;;  %v3033_v41 = vsel %vm363_vm12, 1.0, %v3059_v8  ;;  %vm3060_vm12 = vmmov 1  }
  0x28   :  { %542 = vmatpush.msra.mxu0 %v3212_v50  ;;  %423 = vmatpush.msrb.mxu2 %v3271_v31  ;;  %v3390_v50 = vsub.f32 %v394_v33, %v3373_v34 }
  0x29   :  { %3031 = vmatpush.xpose.msk.msrb.mxu1 %vm60_vm1, %v3129_v13  ;;  %271 = vmatmul.f32.gmra.mxu3 %v123_v40  ;;  %v3361_v13 = vsub.f32 %v391_v45, %v3351_v4 }
  0x2a   :  { %545 = vmatpush.msra.mxu0 %v3226_v58  ;;  %179 = vmatmul.f32.gmra.mxu1 %v3175_v35 }
  0x2b   :  { %425 = vmatpush.msrb.mxu2 %v3283_v39  ;;  %508 = vmatpush.msrb.mxu3 %v507_v22 }
  0x2c   :  { %227 = vmatmul.f32.gmra.mxu2 %v3257_v16  ;;  %548 = vmatpush.msra.mxu0 %v3238_v62  ;;  %v428_v16 = vand.u32 4294901760, %v3361_v13  ;;  %v436_v62 = vand.u32 4294901760, %v3390_v50 }
  0x2d   :  { %3032 = vmatpush.xpose.msk.msrb.mxu1 %vm60_vm1, %v3114_v9  ;;  %645 = vmatpush.msra.mxu2 %v469_v57  ;;  %v25_v9 = vsel %vm24_vm11, %v3308_v47, 0.0 }
  0x2e   :  { %514 = vmatpush.msrb.mxu3 %v513_v25  ;;  %551 = vmatpush.msra.mxu0 %v3241_v63  ;;  %v397_v57 = vsel %vm389_vm10, %v25_v9, 0  ;;  %v437_v63 = vsub.f32 %v3390_v50, %v436_v62 }
  0x2f   :  { %649 = vmatpush.msra.mxu2 %v475_v10  ;;  %134 = vmatmul.f32.gmra.mxu0 %v133_v32 }
  0x30   :  { %700 = vmatpush.msra.mxu3 %v3177_v36  ;;  %554 = vmatpush.msra.mxu0 %v3269_v28 }
  0x31   :  { %594 = vmatpush.msra.mxu1 %v3177_v36  ;;  %277 = vmatmul.f32.gmra.mxu3 %v131_v1  ;;  %v429_v36 = vsub.f32 %v3361_v13, %v428_v16 }
  0x32   :  { %183 = vmatmul.f32.gmra.mxu1 %v3207_v48  ;;  %653 = vmatpush.msra.mxu2 %v481_v17  ;;  %v438_v17 = vand.u32 4294901760, %v437_v63 }
  0x33   :  { %596 = vmatpush.msra.mxu1 %v3209_v49  ;;  %702 = vmatpush.msra.mxu3 %v3209_v49  ;;  %v430_v58 = vand.u32 4294901760, %v429_v36  ;;  %v442_v49 = vand.u32 4294901760, %v397_v57 }
  0x34   :  { %232 = vmatmul.f32.gmra.mxu2 %v130_v30  ;;  %557 = vmatpush.msra.mxu0 %v3281_v38 }
  0x35   :  { %657 = vmatpush.msra.mxu2 %v487_v19  ;;  %704 = vmatpush.msra.mxu3 %v3216_v53 }
  0x36   :  { %598 = vmatpush.msra.mxu1 %v3216_v53  ;;  %560 = vmatpush.msra.mxu0 %v3294_v43  ;;  %v26_v53 = vsel %vm24_vm11, %v18_v3, 0.0 }
  0x37   :  { %661 = vmatpush.msra.mxu2 %v493_v37  ;;  %706 = vmatpush.msra.mxu3 %v3218_v54  ;;  %v400_v10 = vsel %vm389_vm10, %v26_v53, 0 }
  0x38   :  { %600 = vmatpush.msra.mxu1 %v3218_v54  ;;  %310 = vmatmul.f32.vlgmr.msrb.gmra.mxu0 %v3142_v18  ;;  %v443_v54 = vsub.f32 %v397_v57, %v442_v49  ;;  %v450_v28 = vand.u32 4294901760, %v400_v10 }
  0x39   :  { %665 = vmatpush.msra.mxu2 %v499_v46  ;;  %516 = vmatmul.f32.vlgmr.msrb.gmra.mxu3 %v3351_v4 }
  0x3a   :  { %187 = vmatmul.f32.gmra.mxu1 %v3287_v42  ;;  %563 = vmatpush.msra.mxu0 %v3312_v0  ;;  %v444_v19 = vand.u32 4294901760, %v443_v54 }
  0x3b   :  { %708 = vmatpush.msra.mxu3 %v3228_v59  ;;  %602 = vmatpush.msra.mxu1 %v3228_v59 }
  0x3c   :  { %431 = vmatmul.f32.vlgmr.msrb.gmra.mxu2 %v430_v58  ;;  %v445_v59 = vsub.f32 %v443_v54, %v444_v19 }
  0x3d   :  { %669 = vmatpush.msra.mxu2 %v505_v55  ;;  %710 = vmatpush.msra.mxu3 %v3251_v14 }
  0x3e   :  { %604 = vmatpush.msra.mxu1 %v3251_v14  ;;  %v451_v14 = vsub.f32 %v400_v10, %v450_v28  ;;  %v446_v37 = vand.u32 4294901760, %v445_v59 }
  0x3f   :  { %673 = vmatpush.msra.mxu2 %v511_v61  ;;  %712 = vmatpush.msra.mxu3 %v3271_v31 }
  0x40   :  { %606 = vmatpush.msra.mxu1 %v3271_v31  ;;  %314 = vmatmul.f32.gmra.mxu0 %v3175_v35  ;;  %v452_v38 = vand.u32 4294901760, %v451_v14 }
  0x41   :  { %714 = vmatpush.msra.mxu3 %v3283_v39 }
  0x42   :  { %347 = vmatmul.f32.vlgmr.msrb.gmra.mxu1 %v3142_v18  ;;  %520 = vmatmul.f32.gmra.mxu3 %v3373_v34  ;;  %v453_v31 = vsub.f32 %v451_v14, %v452_v38 }
  0x43   :  { %608 = vmatpush.msra.mxu1 %v3283_v39 }
  0x44   :  { %439 = vmatmul.f32.gmra.mxu2 %v438_v17  ;;  %v454_v29 = vand.u32 4294901760, %v453_v31 }
  0x48   :  { %318 = vmatmul.f32.gmra.mxu0 %v3207_v48 }
  0x4a   :  { %351 = vmatmul.f32.gmra.mxu1 %v3175_v35  ;;  %524 = vmatmul.f32.gmra.mxu3 %v442_v49 }
  0x4c   :  { %447 = vmatmul.f32.gmra.mxu2 %v446_v37 }
  0x50   :  { %322 = vmatmul.f32.gmra.mxu0 %v3287_v42 }
  0x52   :  { %355 = vmatmul.f32.gmra.mxu1 %v3207_v48  ;;  %528 = vmatmul.f32.gmra.mxu3 %v450_v28 }
  0x54   :  { %455 = vmatmul.f32.gmra.mxu2 %v454_v29  ;;  %v3036_v29 = vsel %vm366_vm0, 1.0, %v3059_v8 }
  0x58   :  { %566 = vmatmul.f32.vlgmr.msra.gmra.mxu0 %v3361_v13 }
  0x5a   :  { %359 = vmatmul.f32.gmra.mxu1 %v3287_v42  ;;  %716 = vmatmul.f32.vlgmr.msra.gmra.mxu3 %v3351_v4 }
  0x5c   :  { %675 = vmatmul.f32.vlgmr.msra.gmra.mxu2 %v3351_v4 }
  0x60   :  { %571 = vmatmul.f32.gmra.mxu0 %v3390_v50 }
  0x62   :  { %612 = vmatmul.f32.vlgmr.msra.gmra.mxu1 %v428_v16  ;;  %720 = vmatmul.f32.gmra.mxu3 %v3373_v34  ;;  %v3034_v16 = vsel %vm364_vm14, 1.0, %v3059_v8 }
  0x64   :  { %679 = vmatmul.f32.gmra.mxu2 %v3373_v34 }
  0x68   :  { %576 = vmatmul.f32.gmra.mxu0 %v443_v54  ;;  %v3035_v54 = vsel %vm365_vm15, 1.0, %v3059_v8 }
  0x6a   :  { %618 = vmatmul.f32.gmra.mxu1 %v436_v62  ;;  %724 = vmatmul.f32.gmra.mxu3 %v442_v49 }
  0x6c   :  { %683 = vmatmul.f32.gmra.mxu2 %v442_v49 }
  0x70   :  { %581 = vmatmul.f32.gmra.mxu0 %v451_v14 }
  0x72   :  { %624 = vmatmul.f32.gmra.mxu1 %v444_v19  ;;  %728 = vmatmul.f32.gmra.mxu3 %v450_v28 }
  0x74   :  { %687 = vmatmul.f32.gmra.mxu2 %v450_v28 }
  0x7a   :  { %630 = vmatmul.f32.gmra.mxu1 %v452_v38 }
  0x94   :  { %v111_v18 = vpop.f32.mrf.mxu0 }
  0x9b   :  { %v260_v35 = vpop.f32.mrf.mxu3 }
  0x9c   :  { %v119_v48 = vpop.f32.mrf.mxu0 }
  0x9d   :  { %v176_v39 = vpop.f32.mrf.mxu1  ;;  %v218_v40 = vpop.f32.mrf.mxu2 }
  0x9e   :  { %v177_v21 = vadd.f32 %v176_v39, %v111_v18 }
  0xa0   :  { %v219_v56 = vadd.f32 %v218_v40, %v177_v21 }
  0xa2   :  { %v261_v60 = vadd.f32 %v260_v35, %v219_v56 }
  0xa4   :  { %v266_v42 = vpop.f32.mrf.mxu3  ;;  %v127_v20 = vpop.f32.mrf.mxu0 }
  0xa6   :  { %v223_v43 = vpop.f32.mrf.mxu2 }
  0xa7   :  { %v180_v26 = vpop.f32.mrf.mxu1 }
  0xa8   :  { %v181_v61 = vadd.f32 %v180_v26, %v119_v48 }
  0xaa   :  { %v224_v3 = vadd.f32 %v223_v43, %v181_v61 }
  0xac   :  { %v272_v23 = vpop.f32.mrf.mxu3  ;;  %v135_v46 = vpop.f32.mrf.mxu0  ;;  %v267_v22 = vadd.f32 %v266_v42, %v224_v3 }
  0xaf   :  { %v184_v47 = vpop.f32.mrf.mxu1  ;;  %v228_v0 = vpop.f32.mrf.mxu2 }
  0xb0   :  { %v185_v24 = vadd.f32 %v184_v47, %v127_v20 }
  0xb2   :  { %v229_v9 = vadd.f32 %v228_v0, %v185_v24 }
  0xb4   :  { %v278_v30 = vpop.f32.mrf.mxu3  ;;  %v273_v57 = vadd.f32 %v272_v23, %v229_v9 }
  0xb5   :  { %v311_v52 = vpop.f32.mrf.mxu0 }
  0xb6   :  { %v312_v1 = vadd.f32 %v311_v52, %v261_v60 }
  0xb7   :  { %v188_v55 = vpop.f32.mrf.mxu1  ;;  %v233_v11 = vpop.f32.mrf.mxu2 }
  0xb8   :  { %v189_v58 = vadd.f32 %v188_v55, %v135_v46 }
  0xba   :  { %v234_v17 = vadd.f32 %v233_v11, %v189_v58 }
  0xbc   :  { %v517_v51 = vpop.f32.mrf.mxu3  ;;  %v279_v59 = vadd.f32 %v278_v30, %v234_v17 }
  0xbd   :  { %v315_v27 = vpop.f32.mrf.mxu0 }
  0xbe   :  { %v316_v13 = vadd.f32 %v315_v27, %v267_v22 }
  0xbf   :  { %v348_v45 = vpop.f32.mrf.mxu1  ;;  %v432_v12 = vpop.f32.mrf.mxu2 }
  0xc0   :  { %v3446_v4 = vadd.f32 %v348_v45, %v312_v1  ;;  %v433_v8 = vadd.f32 %v3053_v5, %v432_v12 }
  0xc2   :  { %v375_v15 = vadd.f32 %v3033_v41, %v3446_v4  ;;  %v518_v55 = vadd.f32 %v517_v51, %v433_v8  ;;  %v734_v22 = vsel %vm732_vm13, %v3446_v4, 0 }
  0xc3   :  { %v3482_v51 = vand.u32 4294901760, %v734_v22 }
  0xc4   :  { %v3450_v25 = vsel %vm732_vm13, %v375_v15, 0 }
  0xc5   :  { %v521_v2 = vpop.f32.mrf.mxu3  ;;  %v319_v32 = vpop.f32.mrf.mxu0 }
  0xc6   :  { %v320_v49 = vadd.f32 %v319_v32, %v273_v57 }
  0xc7   :  { %v352_v33 = vpop.f32.mrf.mxu1  ;;  %v440_v34 = vpop.f32.mrf.mxu2 }
  0xc8   :  { %v3455_v36 = vadd.f32 %v352_v33, %v316_v13  ;;  %v441_v23 = vadd.f32 %v3053_v5, %v440_v34 }
  0xca   :  { %v376_v50 = vadd.f32 %v3034_v16, %v3455_v36  ;;  %v522_v30 = vadd.f32 %v521_v2, %v441_v23  ;;  %v737_v17 = vsel %vm732_vm13, %v3455_v36, 0 }
  0xcc   :  { %v3459_v62 = vsel %vm732_vm13, %v376_v50, 0 }
  0xcd   :  { %v525_v7 = vpop.f32.mrf.mxu3  ;;  %v323_v53 = vpop.f32.mrf.mxu0 }
  0xce   :  { %v324_v37 = vadd.f32 %v323_v53, %v279_v59 }
  0xcf   :  { %v356_v63 = vpop.f32.mrf.mxu1  ;;  %v448_v10 = vpop.f32.mrf.mxu2 }
  0xd0   :  { %v3464_v19 = vadd.f32 %v356_v63, %v320_v49  ;;  %v449_v0 = vadd.f32 %v3053_v5, %v448_v10  ;;  %v3487_v49 = vsub.f32 %v734_v22, %v3482_v51  ;;  %v1042_v22 = vld [vmem:[%s4106_s3 + $0x78] sm:$0xff] }
  0xd2   :  { %v377_v28 = vadd.f32 %v3035_v54, %v3464_v19  ;;  %v526_v52 = vadd.f32 %v525_v7, %v449_v0  ;;  %v740_v23 = vsel %vm732_vm13, %v3464_v19, 0 }
  0xd4   :  { %v3468_v14 = vsel %vm732_vm13, %v377_v28, 0 }
  0xd5   :  { %v529_v6 = vpop.f32.mrf.mxu3  ;;  %v567_v38 = vpop.f32.mrf.mxu0 }
  0xd6   :  { %v568_v61 = vadd.f32 %v567_v38, %v518_v55  ;;  %v781_v55 = vand.u32 4294901760, %v740_v23 }
  0xd7   :  { %v360_v31 = vpop.f32.mrf.mxu1  ;;  %v456_v18 = vpop.f32.mrf.mxu2 }
  0xd8   :  { %v361_v35 = vadd.f32 %v360_v31, %v324_v37  ;;  %v457_v41 = vadd.f32 %v3053_v5, %v456_v18 }
  0xda   :  { %v378_v48 = vadd.f32 %v3036_v29, %v361_v35  ;;  %v743_v24 = vsel %vm732_vm13, %v361_v35, 0  ;;  %v530_v32 = vadd.f32 %v529_v6, %v457_v41  ;;  %v767_v6 = vand.u32 4294901760, %v3487_v49 }
  0xdb   :  { %v3484_v33 = vand.u32 4294901760, %v743_v24  ;;  %v3503_v29 = vand.u32 4294901760, %v737_v17 }
  0xdc   :  { %v3474_v39 = vsel %vm732_vm13, %v378_v48, 0  ;;  %vm3950_vm13 = vmxor %vm3060_vm12, %vm24_vm11 }
  0xdd   :  { %v717_v40 = vpop.f32.mrf.mxu3  ;;  %v572_v42 = vpop.f32.mrf.mxu0  ;;  %v3490_v4 = vsub.f32 %v743_v24, %v3484_v33  ;;  %v3551_v24 = vand.u32 4294901760, %v1042_v22 }
  0xde   :  { %v573_v11 = vadd.f32 %v572_v42, %v522_v30 }
  0xdf   :  { %v613_v20 = vpop.f32.mrf.mxu1  ;;  %v676_v26 = vpop.f32.mrf.mxu2  ;;  %v791_v37 = vand.u32 4294901760, %v3490_v4 }
  0xe0   :  { %v614_v15 = vadd.f32 %v613_v20, %v568_v61  ;;  %v782_v61 = vsub.f32 %v740_v23, %v781_v55 }
  0xe1   :  { %v792_v42 = vsub.f32 %v3490_v4, %v791_v37 }
  0xe2   :  { %v677_v16 = vadd.f32 %v676_v26, %v614_v15  ;;  %v3514_v26 = vsub.f32 %v737_v17, %v3503_v29  ;;  %v783_v41 = vand.u32 4294901760, %v782_v61 }
  0xe3   :  { %v793_v0 = vand.u32 4294901760, %v792_v42 }
  0xe4   :  { %v718_v53 = vadd.f32 %v717_v40, %v677_v16  ;;  %v768_v40 = vsub.f32 %v3487_v49, %v767_v6 }
  0xe5   :  { %v721_v43 = vpop.f32.mrf.mxu3  ;;  %v577_v21 = vpop.f32.mrf.mxu0 }
  0xe6   :  { %v578_v56 = vadd.f32 %v577_v21, %v526_v52  ;;  %v3500_v38 = vand.u32 4294901760, %v718_v53  ;;  %v775_v52 = vand.u32 4294901760, %v3514_v26 }
  0xe7   :  { %v619_v46 = vpop.f32.mrf.mxu1  ;;  %v680_v47 = vpop.f32.mrf.mxu2 }
  0xe8   :  { %v620_v1 = vadd.f32 %v619_v46, %v573_v11  ;;  %v829_v36 = vsub.f32 %v718_v53, %v3500_v38 }
  0xea   :  { %v681_v13 = vadd.f32 %v680_v47, %v620_v1  ;;  %v769_v47 = vand.u32 4294901760, %v768_v40  ;;  %v830_v21 = vand.u32 4294901760, %v829_v36  ;;  %v1035_v40 = vld [vmem:[%s4106_s3 + $0x40] sm:$0xff] }
  0xec   :  { %v722_v50 = vadd.f32 %v721_v43, %v681_v13  ;;  %v3557_v13 = vsub.f32 %v1042_v22, %v3551_v24 }
  0xed   :  { %v725_v60 = vpop.f32.mrf.mxu3  ;;  %v582_v2 = vpop.f32.mrf.mxu0 }
  0xee   :  { %v583_v9 = vadd.f32 %v582_v2, %v530_v32  ;;  %v3496_v28 = vand.u32 4294901760, %v722_v50  ;;  %v1040_v32 = vld [vmem:[%s4106_s3 + $0x68] sm:$0xff] }
  0xef   :  { %v625_v27 = vpop.f32.mrf.mxu1  ;;  %v684_v45 = vpop.f32.mrf.mxu2  ;;  %v3571_v16 = vand.u32 4294901760, %v1040_v32 }
  0xf0   :  { %v626_v3 = vadd.f32 %v625_v27, %v578_v56  ;;  %v823_v35 = vsub.f32 %v722_v50, %v3496_v28  ;;  %v831_v56 = vsub.f32 %v829_v36, %v830_v21 }
  0xf2   :  { %v685_v12 = vadd.f32 %v684_v45, %v626_v3  ;;  %v824_v43 = vand.u32 4294901760, %v823_v35  ;;  %v832_v27 = vand.u32 4294901760, %v831_v56  ;;  %v784_v3 = vsub.f32 %v782_v61, %v783_v41 }
  0xf4   :  { %v726_v34 = vadd.f32 %v725_v60, %v685_v12  ;;  %v825_v19 = vsub.f32 %v823_v35, %v824_v43  ;;  %v776_v60 = vsub.f32 %v3514_v26, %v775_v52  ;;  %v785_v15 = vand.u32 4294901760, %v784_v3  ;;  %v1041_v12 = vld [vmem:[%s4106_s3 + $0x70] sm:$0xff] }
  0xf5   :  { %v729_v54 = vpop.f32.mrf.mxu3  ;;  %v3559_v2 = vand.u32 4294901760, %v1041_v12 }
  0xf6   :  { %v3492_v63 = vand.u32 4294901760, %v726_v34  ;;  %v826_v1 = vand.u32 4294901760, %v825_v19  ;;  %v777_v45 = vand.u32 4294901760, %v776_v60 }
  0xf7   :  { %v631_v57 = vpop.f32.mrf.mxu1  ;;  %v688_v58 = vpop.f32.mrf.mxu2 }
  0xf8   :  { %v632_v7 = vadd.f32 %v631_v57, %v583_v9  ;;  %v817_v31 = vsub.f32 %v726_v34, %v3492_v63  ;;  %v1039_v34 = vld [vmem:[%s4106_s3 + $0x60] sm:$0xff]  ;;  %v3583_v57 = vsub.f32 %v1040_v32, %v3571_v16 }
  0xfa   :  { %v689_v10 = vadd.f32 %v688_v58, %v632_v7  ;;  %v818_v20 = vand.u32 4294901760, %v817_v31  ;;  %v3586_v58 = vand.u32 4294901760, %v1039_v34  ;;  %v1038_v7 = vld [vmem:[%s4106_s3 + $0x58] sm:$0xff]  ;;  %v1136_v53 = vand.u32 4294901760, %v3583_v57 }
  0xfc   :  { %v730_v59 = vadd.f32 %v729_v54, %v689_v10  ;;  %v819_v8 = vsub.f32 %v817_v31, %v818_v20  ;;  %v3600_v54 = vand.u32 4294901760, %v1038_v7  ;;  %v1037_v10 = vld [vmem:[%s4106_s3 + $0x50] sm:$0xff] }
  0xfe   :  { %v757_v18 = vand.u32 4294901760, %v730_v59  ;;  %v820_v11 = vand.u32 4294901760, %v819_v8 }
 0x100   :  { %v811_v48 = vsub.f32 %v730_v59, %v757_v18  ;;  %758 = vmatpush.msrb.mxu0 %v757_v18  ;;  %3037 = vmatpush.msrb.mxu2 %v757_v18 }
 0x102   :  { %760 = vmatpush.msrb.mxu0 %v3492_v63  ;;  %3038 = vmatpush.msrb.mxu2 %v3492_v63  ;;  %v812_v5 = vand.u32 4294901760, %v811_v48 }
 0x104   :  { %762 = vmatpush.msrb.mxu0 %v3496_v28  ;;  %3039 = vmatpush.msrb.mxu2 %v3496_v28  ;;  %v813_v46 = vsub.f32 %v811_v48, %v812_v5 }
 0x106   :  { %764 = vmatpush.msrb.mxu0 %v3500_v38  ;;  %3040 = vmatpush.msrb.mxu2 %v3500_v38  ;;  %v814_v30 = vand.u32 4294901760, %v813_v46 }
 0x107   :  { %770 = vmatmul.f32.vlgmr.msrb.gmra.mxu0 %v769_v47  ;;  %794 = vmatmul.f32.vlgmr.msrb.gmra.mxu2 %v793_v0 }
 0x108   :  { %865 = vmatpush.msra.mxu2 %v811_v48  ;;  %956 = vmatpush.msra.mxu0 %v812_v5  ;;  %v1079_v5 = vand.u32 4294901760, %v1035_v40 }
 0x109   :  { %815 = vmatpush.msrb.mxu1 %v814_v30  ;;  %3041 = vmatpush.msrb.mxu3 %v814_v30 }
 0x10a   :  { %868 = vmatpush.msra.mxu2 %v817_v31  ;;  %960 = vmatpush.msra.mxu0 %v818_v20  ;;  %v1165_v47 = vsub.f32 %v1035_v40, %v1079_v5 }
 0x10b   :  { %821 = vmatpush.msrb.mxu1 %v820_v11  ;;  %3042 = vmatpush.msrb.mxu3 %v820_v11 }
 0x10c   :  { %871 = vmatpush.msra.mxu2 %v823_v35  ;;  %964 = vmatpush.msra.mxu0 %v824_v43  ;;  %v1166_v30 = vand.u32 4294901760, %v1165_v47 }
 0x10d   :  { %827 = vmatpush.msrb.mxu1 %v826_v1  ;;  %3043 = vmatpush.msrb.mxu3 %v826_v1 }
 0x10e   :  { %874 = vmatpush.msra.mxu2 %v829_v36  ;;  %968 = vmatpush.msra.mxu0 %v830_v21  ;;  %v1167_v19 = vsub.f32 %v1165_v47, %v1166_v30 }
 0x10f   :  { %833 = vmatpush.msrb.mxu1 %v832_v27  ;;  %3044 = vmatpush.msrb.mxu3 %v832_v27 }
 0x110   :  { %778 = vmatmul.f32.gmra.mxu0 %v777_v45  ;;  %835 = vmatmul.f32.vlgmr.msrb.gmra.mxu1 %v3482_v51  ;;  %v1168_v60 = vand.u32 4294901760, %v1167_v19 }
 0x111   :  { %847 = vmatmul.f32.vlgmr.msrb.gmra.mxu3 %v3484_v33  ;;  %877 = vmatmul.f32.vlgmr.msra.gmra.mxu2 %v3487_v49 }
 0x112   :  { %909 = vmatpush.msra.mxu3 %v757_v18  ;;  %999 = vmatpush.msra.mxu1 %v757_v18 }
 0x113   :  { %1066 = vmatpush.msrb.mxu2 %v3551_v24  ;;  %1197 = vmatpush.msrb.mxu0 %v3557_v13 }
 0x114   :  { %911 = vmatpush.msra.mxu3 %v3492_v63  ;;  %1001 = vmatpush.msra.mxu1 %v3492_v63  ;;  %v1141_v63 = vsub.f32 %v1039_v34, %v3586_v58 }
 0x115   :  { %1068 = vmatpush.msrb.mxu2 %v3559_v2 }
 0x116   :  { %913 = vmatpush.msra.mxu3 %v3496_v28  ;;  %1003 = vmatpush.msra.mxu1 %v3496_v28  ;;  %v1137_v28 = vsub.f32 %v3583_v57, %v1136_v53  ;;  %v1142_v59 = vand.u32 4294901760, %v1141_v63 }
 0x117   :  { %1070 = vmatpush.msrb.mxu2 %v3571_v16 }
 0x118   :  { %915 = vmatpush.msra.mxu3 %v3500_v38  ;;  %1005 = vmatpush.msra.mxu1 %v3500_v38  ;;  %v1036_v38 = vld [vmem:[%s4106_s3 + $0x48] sm:$0xff]  ;;  %v1138_v31 = vand.u32 4294901760, %v1137_v28 }
 0x119   :  { %786 = vmatmul.f32.gmra.mxu0 %v785_v15  ;;  %839 = vmatmul.f32.gmra.mxu1 %v3503_v29  ;;  %v1077_v35 = vand.u32 4294901760, %v1036_v38 }
 0x11a   :  { %882 = vmatmul.f32.gmra.mxu2 %v3514_v26  ;;  %919 = vmatmul.f32.vlgmr.msra.gmra.mxu3 %v767_v6  ;;  %v3607_v6 = vand.u32 4294901760, %v1037_v10 }
 0x11b   :  { %1249 = vmatpush.msrb.mxu1 %v3551_v24  ;;  %1072 = vmatpush.msrb.mxu2 %v3586_v58  ;;  %v1159_v26 = vsub.f32 %v1036_v38, %v1077_v35 }
 0x11c   :  { %v1153_v18 = vsub.f32 %v1037_v10, %v3607_v6 }
 0x11d   :  { %1251 = vmatpush.msrb.mxu1 %v3559_v2  ;;  %1074 = vmatpush.msrb.mxu2 %v3600_v54  ;;  %v1160_v46 = vand.u32 4294901760, %v1159_v26 }
 0x11e   :  { %v1154_v20 = vand.u32 4294901760, %v1153_v18 }
 0x11f   :  { %1253 = vmatpush.msrb.mxu1 %v3571_v16  ;;  %1076 = vmatpush.msrb.mxu2 %v3607_v6  ;;  %v1161_v21 = vsub.f32 %v1159_v26, %v1160_v46 }
 0x120   :  { %v1155_v23 = vsub.f32 %v1153_v18, %v1154_v20 }
 0x121   :  { %843 = vmatmul.f32.gmra.mxu1 %v781_v55  ;;  %970 = vmatmul.f32.vlgmr.msra.gmra.mxu0 %v3482_v51 }
 0x122   :  { %887 = vmatmul.f32.gmra.mxu2 %v782_v61  ;;  %925 = vmatmul.f32.gmra.mxu3 %v775_v52  ;;  %v1156_v8 = vand.u32 4294901760, %v1155_v23 }
 0x123   :  { %1255 = vmatpush.msrb.mxu1 %v3586_v58  ;;  %1078 = vmatpush.msrb.mxu2 %v1077_v35 }
 0x125   :  { %1257 = vmatpush.msrb.mxu1 %v3600_v54  ;;  %1080 = vmatpush.msrb.mxu2 %v1079_v5 }
 0x127   :  { %1259 = vmatpush.msrb.mxu1 %v3607_v6 }
 0x129   :  { %974 = vmatmul.f32.gmra.mxu0 %v3503_v29  ;;  %1007 = vmatmul.f32.vlgmr.msra.gmra.mxu1 %v3482_v51  ;;  %v1124_v51 = vand.u32 4294901760, %v3557_v13 }
 0x12a   :  { %892 = vmatmul.f32.gmra.mxu2 %v3490_v4  ;;  %931 = vmatmul.f32.gmra.mxu3 %v783_v41 }
 0x12b   :  { %v1125_v9 = vsub.f32 %v3557_v13, %v1124_v51  ;;  %1261 = vmatpush.msrb.mxu1 %v1077_v35  ;;  %1300 = vmatpush.msra.mxu2 %v1124_v51 }
 0x12d   :  { %v1126_v49 = vand.u32 4294901760, %v1125_v9  ;;  %1263 = vmatpush.msrb.mxu1 %v1079_v5 }
 0x12f   :  { %1127 = vmatpush.msrb.mxu3 %v1126_v49 }
 0x131   :  { %978 = vmatmul.f32.gmra.mxu0 %v781_v55  ;;  %1011 = vmatmul.f32.gmra.mxu1 %v3503_v29  ;;  %v1143_v29 = vsub.f32 %v1141_v63, %v1142_v59 }
 0x132   :  { %937 = vmatmul.f32.gmra.mxu3 %v791_v37  ;;  %v1147_v37 = vsub.f32 %v1038_v7, %v3600_v54 }
 0x133   :  { %v1144_v42 = vand.u32 4294901760, %v1143_v29 }
 0x134   :  { %v1148_v36 = vand.u32 4294901760, %v1147_v37 }
 0x136   :  { %v1149_v43 = vsub.f32 %v1147_v37, %v1148_v36 }
 0x138   :  { %v1150_v0 = vand.u32 4294901760, %v1149_v43 }
 0x139   :  { %982 = vmatmul.f32.gmra.mxu0 %v3484_v33  ;;  %1015 = vmatmul.f32.gmra.mxu1 %v781_v55  ;;  %v1162_v55 = vand.u32 4294901760, %v1161_v21 }
 0x141   :  { %1019 = vmatmul.f32.gmra.mxu1 %v3484_v33  ;;  %v3568_v33 = vsub.f32 %v1041_v12, %v3559_v2 }
 0x143   :  { %v1130_v50 = vand.u32 4294901760, %v3568_v33  ;;  %1200 = vmatpush.msrb.mxu0 %v3568_v33 }
 0x145   :  { %v1131_v4 = vsub.f32 %v3568_v33, %v1130_v50  ;;  %1203 = vmatpush.msrb.mxu0 %v3583_v57  ;;  %1304 = vmatpush.msra.mxu2 %v1130_v50 }
 0x147   :  { %v1132_v17 = vand.u32 4294901760, %v1131_v4  ;;  %1206 = vmatpush.msrb.mxu0 %v1141_v63  ;;  %1308 = vmatpush.msra.mxu2 %v1136_v53 }
 0x149   :  { %1133 = vmatpush.msrb.mxu3 %v1132_v17  ;;  %1209 = vmatpush.msrb.mxu0 %v1147_v37 }
 0x14a   :  { %1312 = vmatpush.msra.mxu2 %v1142_v59 }
 0x14b   :  { %1139 = vmatpush.msrb.mxu3 %v1138_v31  ;;  %1212 = vmatpush.msrb.mxu0 %v1153_v18 }
 0x14c   :  { %1316 = vmatpush.msra.mxu2 %v1148_v36 }
 0x14d   :  { %1145 = vmatpush.msrb.mxu3 %v1144_v42  ;;  %1215 = vmatpush.msrb.mxu0 %v1159_v26 }
 0x14e   :  { %1320 = vmatpush.msra.mxu2 %v1154_v20 }
 0x14f   :  { %1151 = vmatpush.msrb.mxu3 %v1150_v0  ;;  %1218 = vmatpush.msrb.mxu0 %v1165_v47 }
 0x150   :  { %1324 = vmatpush.msra.mxu2 %v1160_v46 }
 0x151   :  { %1157 = vmatpush.msrb.mxu3 %v1156_v8 }
 0x152   :  { %1328 = vmatpush.msra.mxu2 %v1166_v30 }
 0x153   :  { %1163 = vmatpush.msrb.mxu3 %v1162_v55 }
 0x155   :  { %1169 = vmatpush.msrb.mxu3 %v1168_v60 }
 0x157   :  { %1355 = vmatpush.msra.mxu3 %v3551_v24 }
 0x159   :  { %1357 = vmatpush.msra.mxu3 %v3559_v2 }
 0x15b   :  { %1359 = vmatpush.msra.mxu3 %v3571_v16 }
 0x15d   :  { %1361 = vmatpush.msra.mxu3 %v3586_v58 }
 0x15f   :  { %1363 = vmatpush.msra.mxu3 %v3600_v54 }
 0x161   :  { %1365 = vmatpush.msra.mxu3 %v3607_v6 }
 0x163   :  { %1367 = vmatpush.msra.mxu3 %v1077_v35 }
 0x165   :  { %1369 = vmatpush.msra.mxu3 %v1079_v5 }
 0x184   :  { %v771_v48 = vpop.f32.mrf.mxu0 }
 0x18a   :  { %v3621_v52 = vpop.f32.mrf.mxu2 }
 0x18d   :  { %v779_v11 = vpop.f32.mrf.mxu0  ;;  %v836_v56 = vpop.f32.mrf.mxu1 }
 0x18e   :  { %v837_v41 = vadd.f32 %v836_v56, %v771_v48 }
 0x194   :  { %v848_v61 = vpop.f32.mrf.mxu3  ;;  %v878_v1 = vpop.f32.mrf.mxu2 }
 0x195   :  { %v879_v24 = vadd.f32 %v878_v1, %v837_v41  ;;  %v849_v36 = vadd.f32 %v848_v61, %v3621_v52 }
 0x196   :  { %v787_v27 = vpop.f32.mrf.mxu0  ;;  %v840_v45 = vpop.f32.mrf.mxu1 }
 0x197   :  { %v841_v2 = vadd.f32 %v840_v45, %v779_v11 }
 0x19d   :  { %v920_v3 = vpop.f32.mrf.mxu3  ;;  %v883_v12 = vpop.f32.mrf.mxu2 }
 0x19e   :  { %v844_v15 = vpop.f32.mrf.mxu1  ;;  %v971_v22 = vpop.f32.mrf.mxu0  ;;  %v921_v13 = vadd.f32 %v920_v3, %v879_v24  ;;  %v884_v34 = vadd.f32 %v883_v12, %v841_v2 }
 0x19f   :  { %v845_v4 = vadd.f32 %v844_v15, %v787_v27 }
 0x1a0   :  { %v972_v32 = vadd.f32 %v971_v22, %v921_v13 }
 0x1a5   :  { %v926_v51 = vpop.f32.mrf.mxu3  ;;  %v888_v58 = vpop.f32.mrf.mxu2 }
 0x1a6   :  { %v975_v33 = vpop.f32.mrf.mxu0  ;;  %v1008_v16 = vpop.f32.mrf.mxu1  ;;  %v927_v50 = vadd.f32 %v926_v51, %v884_v34  ;;  %v889_v17 = vadd.f32 %v888_v58, %v845_v4 }
 0x1a7   :  { %v1009_v9 = vadd.f32 %v1008_v16, %v972_v32 }
 0x1a8   :  { %v976_v53 = vadd.f32 %v975_v33, %v927_v50 }
 0x1a9   :  { %vm1023_vm1 = vcmp.ge.f32.partialorder %v1009_v9, 0.0  ;;  %v1027_v57 = vmul.f32 0.2, %v1009_v9 }
 0x1ab   :  { %v1031_v7 = vsel %vm1023_vm1, %v1009_v9, %v1027_v57 }
 0x1ac   :  { %v1046_v49 = vsel %vm389_vm10, %v1031_v7, 0 }
 0x1ad   :  { %v932_v63 = vpop.f32.mrf.mxu3  ;;  %v3634_v54 = vand.u32 4294901760, %v1046_v49  ;;  %v893_v35 = vpop.f32.mrf.mxu2 }
 0x1ae   :  { %v1012_v10 = vpop.f32.mrf.mxu1  ;;  %v979_v6 = vpop.f32.mrf.mxu0  ;;  %v933_v37 = vadd.f32 %v932_v63, %v889_v17  ;;  %v894_v43 = vadd.f32 %v893_v35, %v849_v36 }
 0x1af   :  { %v1013_v28 = vadd.f32 %v1012_v10, %v976_v53  ;;  %1171 = vmatmul.f32.vlgmr.msrb.gmra.mxu3 %v3634_v54  ;;  %v1082_v59 = vsub.f32 %v1046_v49, %v3634_v54 }
 0x1b0   :  { %v980_v40 = vadd.f32 %v979_v6, %v933_v37 }
 0x1b1   :  { %vm1024_vm2 = vcmp.ge.f32.partialorder %v1013_v28, 0.0  ;;  %v1028_v38 = vmul.f32 0.2, %v1013_v28  ;;  %1221 = vmatmul.f32.vlgmr.msrb.gmra.mxu0 %v1082_v59  ;;  %v1083_v31 = vand.u32 4294901760, %v1082_v59 }
 0x1b3   :  { %v1032_v29 = vsel %vm1024_vm2, %v1013_v28, %v1028_v38  ;;  %1267 = vmatmul.f32.vlgmr.msrb.gmra.mxu1 %v1083_v31  ;;  %v1084_v18 = vsub.f32 %v1082_v59, %v1083_v31 }
 0x1b4   :  { %v1049_v48 = vsel %vm389_vm10, %v1032_v29, 0 }
 0x1b5   :  { %v1085_v42 = vand.u32 4294901760, %v1084_v18  ;;  %v1089_v20 = vand.u32 4294901760, %v1049_v48  ;;  %v938_v26 = vpop.f32.mrf.mxu3 }
 0x1b6   :  { %v1016_v5 = vpop.f32.mrf.mxu1  ;;  %v939_v47 = vadd.f32 %v938_v26, %v894_v43  ;;  %v983_v21 = vpop.f32.mrf.mxu0 }
 0x1b7   :  { %v1017_v23 = vadd.f32 %v1016_v5, %v980_v40  ;;  %1086 = vmatmul.f32.vlgmr.msrb.gmra.mxu2 %v1085_v42  ;;  %1175 = vmatmul.f32.gmra.mxu3 %v1089_v20  ;;  %v1090_v46 = vsub.f32 %v1049_v48, %v1089_v20 }
 0x1b8   :  { %v984_v19 = vadd.f32 %v983_v21, %v939_v47  ;;  %v3648_v21 = vand.u32 4294901760, %v3450_v25 }
 0x1b9   :  { %vm1025_vm3 = vcmp.ge.f32.partialorder %v1017_v23, 0.0  ;;  %v1029_v0 = vmul.f32 0.2, %v1017_v23  ;;  %1226 = vmatmul.f32.gmra.mxu0 %v1090_v46  ;;  %v1091_v8 = vand.u32 4294901760, %v1090_v46 }
 0x1bb   :  { %v1033_v30 = vsel %vm1025_vm3, %v1017_v23, %v1029_v0  ;;  %1273 = vmatmul.f32.gmra.mxu1 %v1091_v8  ;;  %v1092_v55 = vsub.f32 %v1090_v46, %v1091_v8 }
 0x1bc   :  { %v1052_v52 = vsel %vm389_vm10, %v1033_v30, 0 }
 0x1bd   :  { %v1093_v11 = vand.u32 4294901760, %v1092_v55  ;;  %v1097_v56 = vand.u32 4294901760, %v1052_v52 }
 0x1be   :  { %v1020_v60 = vpop.f32.mrf.mxu1 }
 0x1bf   :  { %v1021_v61 = vadd.f32 %v1020_v60, %v984_v19  ;;  %1094 = vmatmul.f32.gmra.mxu2 %v1093_v11  ;;  %1179 = vmatmul.f32.gmra.mxu3 %v1097_v56  ;;  %v1098_v1 = vsub.f32 %v1052_v52, %v1097_v56 }
 0x1c1   :  { %vm1026_vm4 = vcmp.ge.f32.partialorder %v1021_v61, 0.0  ;;  %v1030_v27 = vmul.f32 0.2, %v1021_v61  ;;  %1231 = vmatmul.f32.gmra.mxu0 %v1098_v1  ;;  %v1099_v45 = vand.u32 4294901760, %v1098_v1 }
 0x1c3   :  { %v1034_v41 = vsel %vm1026_vm4, %v1021_v61, %v1030_v27  ;;  %1279 = vmatmul.f32.gmra.mxu1 %v1099_v45  ;;  %v1100_v3 = vsub.f32 %v1098_v1, %v1099_v45 }
 0x1c4   :  { %v1055_v15 = vsel %vm389_vm10, %v1034_v41, 0 }
 0x1c5   :  { %v1101_v22 = vand.u32 4294901760, %v1100_v3  ;;  %v1105_v24 = vand.u32 4294901760, %v1055_v15 }
 0x1c7   :  { %1102 = vmatmul.f32.gmra.mxu2 %v1101_v22  ;;  %1183 = vmatmul.f32.gmra.mxu3 %v1105_v24  ;;  %v1106_v12 = vsub.f32 %v1055_v15, %v1105_v24 }
 0x1c9   :  { %1236 = vmatmul.f32.gmra.mxu0 %v1106_v12  ;;  %v1107_v13 = vand.u32 4294901760, %v1106_v12 }
 0x1cb   :  { %1285 = vmatmul.f32.gmra.mxu1 %v1107_v13  ;;  %v1108_v2 = vsub.f32 %v1106_v12, %v1107_v13 }
 0x1cd   :  { %v1109_v32 = vand.u32 4294901760, %v1108_v2 }
 0x1cf   :  { %1110 = vmatmul.f32.gmra.mxu2 %v1109_v32  ;;  %1371 = vmatmul.f32.vlgmr.msra.gmra.mxu3 %v3634_v54 }
 0x1d7   :  { %1330 = vmatmul.f32.vlgmr.msra.gmra.mxu2 %v3634_v54  ;;  %1375 = vmatmul.f32.gmra.mxu3 %v1089_v20  ;;  %v3054_v54 = vld [vmem:[%s4106_s3 + $0x148] ss:$0 sm:$0xff] }
 0x1df   :  { %1334 = vmatmul.f32.gmra.mxu2 %v1089_v20  ;;  %1379 = vmatmul.f32.gmra.mxu3 %v1097_v56 }
 0x1e7   :  { %1338 = vmatmul.f32.gmra.mxu2 %v1097_v56  ;;  %1383 = vmatmul.f32.gmra.mxu3 %v1105_v24  ;;  %v3652_v56 = vsub.f32 %v3450_v25, %v3648_v21 }
 0x1e9   :  { %v3659_v22 = vand.u32 4294901760, %v3652_v56 }
 0x1ef   :  { %1342 = vmatmul.f32.gmra.mxu2 %v1105_v24  ;;  %v3662_v24 = vand.u32 4294901760, %v3459_v62 }
 0x22e   :  { %v1222_v58 = vpop.f32.mrf.mxu0 }
 0x230   :  { %v1268_v7 = vpop.f32.mrf.mxu1 }
 0x232   :  { %v1172_v51 = vpop.f32.mrf.mxu3 }
 0x236   :  { %v1227_v53 = vpop.f32.mrf.mxu0 }
 0x238   :  { %v1274_v10 = vpop.f32.mrf.mxu1 }
 0x23a   :  { %v1087_v33 = vpop.f32.mrf.mxu2  ;;  %v1176_v16 = vpop.f32.mrf.mxu3 }
 0x23b   :  { %v1088_v59 = vadd.f32 %v3054_v54, %v1087_v33  ;;  %v3670_v33 = vsub.f32 %v3459_v62, %v3662_v24 }
 0x23d   :  { %v1173_v18 = vadd.f32 %v1172_v51, %v1088_v59  ;;  %v1422_v51 = vsub.f32 %v3652_v56, %v3659_v22 }
 0x23e   :  { %v1232_v38 = vpop.f32.mrf.mxu0 }
 0x23f   :  { %v1223_v42 = vadd.f32 %v1222_v58, %v1173_v18 }
 0x240   :  { %v1280_v36 = vpop.f32.mrf.mxu1 }
 0x241   :  { %v1269_v0 = vadd.f32 %v1268_v7, %v1223_v42  ;;  %v3678_v7 = vand.u32 4294901760, %v3468_v14  ;;  %v1695_v42 = vld [vmem:[%s4106_s3 + $0xb0] sm:$0xff] }
 0x242   :  { %v1095_v34 = vpop.f32.mrf.mxu2  ;;  %v1180_v9 = vpop.f32.mrf.mxu3 }
 0x243   :  { %v1096_v28 = vadd.f32 %v3054_v54, %v1095_v34 }
 0x245   :  { %v1177_v31 = vadd.f32 %v1176_v16, %v1096_v28 }
 0x246   :  { %v1237_v47 = vpop.f32.mrf.mxu0 }
 0x247   :  { %v1228_v40 = vadd.f32 %v1227_v53, %v1177_v31 }
 0x248   :  { %v1286_v19 = vpop.f32.mrf.mxu1 }
 0x249   :  { %v1275_v5 = vadd.f32 %v1274_v10, %v1228_v40 }
 0x24a   :  { %v1103_v50 = vpop.f32.mrf.mxu2  ;;  %v1184_v57 = vpop.f32.mrf.mxu3 }
 0x24b   :  { %v1104_v17 = vadd.f32 %v3054_v54, %v1103_v50 }
 0x24d   :  { %v1181_v37 = vadd.f32 %v1180_v9, %v1104_v17 }
 0x24f   :  { %v1233_v48 = vadd.f32 %v1232_v38, %v1181_v37 }
 0x251   :  { %v1281_v26 = vadd.f32 %v1280_v36, %v1233_v48  ;;  %v1696_v36 = vld [vmem:[%s4106_s3 + $0xb8] sm:$0xff] }
 0x252   :  { %v1111_v49 = vpop.f32.mrf.mxu2  ;;  %v1372_v4 = vpop.f32.mrf.mxu3  ;;  %v3742_v40 = vand.u32 4294901760, %v1696_v36 }
 0x253   :  { %v1112_v35 = vadd.f32 %v3054_v54, %v1111_v49  ;;  %v3688_v54 = vsub.f32 %v3468_v14, %v3678_v7 }
 0x255   :  { %v1185_v20 = vadd.f32 %v1184_v57, %v1112_v35  ;;  %v3675_v57 = vand.u32 4294901760, %v1422_v51  ;;  %v3699_v38 = vand.u32 4294901760, %v3688_v54 }
 0x257   :  { %v1238_v30 = vadd.f32 %v1237_v47, %v1185_v20  ;;  %v3748_v20 = vsub.f32 %v1696_v36, %v3742_v40  ;;  %v1693_v47 = vld [vmem:[%s4106_s3 + $0xa0] sm:$0xff] }
 0x259   :  { %v1287_v60 = vadd.f32 %v1286_v19, %v1238_v30  ;;  %v1692_v19 = vld [vmem:[%s4106_s3 + $0x98] sm:$0xff] }
 0x25a   :  { %v1331_v63 = vpop.f32.mrf.mxu2  ;;  %v1376_v6 = vpop.f32.mrf.mxu3 }
 0x25b   :  { %v1332_v55 = vadd.f32 %v1331_v63, %v1269_v0 }
 0x25d   :  { %v1373_v61 = vadd.f32 %v1372_v4, %v1332_v55  ;;  %v3682_v4 = vand.u32 4294901760, %v3670_v33 }
 0x25f   :  { %v1417_v12 = vand.u32 4294901760, %v1373_v61  ;;  %v1430_v28 = vsub.f32 %v3670_v33, %v3682_v4 }
 0x261   :  { %v1483_v16 = vsub.f32 %v1373_v61, %v1417_v12  ;;  %v3696_v14 = vand.u32 4294901760, %v1430_v28 }
 0x262   :  { %v1335_v29 = vpop.f32.mrf.mxu2  ;;  %v1380_v43 = vpop.f32.mrf.mxu3 }
 0x263   :  { %v1336_v8 = vadd.f32 %v1335_v29, %v1275_v5  ;;  %v1484_v49 = vand.u32 4294901760, %v1483_v16  ;;  %v1438_v29 = vsub.f32 %v3688_v54, %v3699_v38  ;;  %v1694_v5 = vld [vmem:[%s4106_s3 + $0xa8] sm:$0xff] }
 0x265   :  { %v1377_v11 = vadd.f32 %v1376_v6, %v1336_v8  ;;  %v1485_v17 = vsub.f32 %v1483_v16, %v1484_v49  ;;  %v3694_v6 = vand.u32 4294901760, %v3474_v39  ;;  %v3713_v18 = vand.u32 4294901760, %v1438_v29 }
 0x267   :  { %v3656_v41 = vand.u32 4294901760, %v1377_v11  ;;  %v1486_v37 = vand.u32 4294901760, %v1485_v17  ;;  %v3706_v31 = vsub.f32 %v3474_v39, %v3694_v6 }
 0x269   :  { %v1477_v2 = vsub.f32 %v1377_v11, %v3656_v41  ;;  %v3716_v35 = vand.u32 4294901760, %v3706_v31 }
 0x26a   :  { %v1339_v23 = vpop.f32.mrf.mxu2  ;;  %v1384_v3 = vpop.f32.mrf.mxu3 }
 0x26b   :  { %v1340_v46 = vadd.f32 %v1339_v23, %v1281_v26  ;;  %v1478_v50 = vand.u32 4294901760, %v1477_v2  ;;  %v1446_v39 = vsub.f32 %v3706_v31, %v3716_v35  ;;  %v3750_v26 = vand.u32 4294901760, %v1695_v42 }
 0x26d   :  { %v1381_v52 = vadd.f32 %v1380_v43, %v1340_v46  ;;  %v1479_v63 = vsub.f32 %v1477_v2, %v1478_v50  ;;  %v3724_v48 = vand.u32 4294901760, %v1446_v39  ;;  %v1778_v43 = vand.u32 4294901760, %v3748_v20 }
 0x26e   :  { %v3759_v23 = vsub.f32 %v1695_v42, %v3750_v26  ;;  %v3762_v46 = vand.u32 4294901760, %v1694_v5 }
 0x26f   :  { %v3654_v1 = vand.u32 4294901760, %v1381_v52  ;;  %v1480_v59 = vand.u32 4294901760, %v1479_v63  ;;  %v1779_v8 = vsub.f32 %v3748_v20, %v1778_v43 }
 0x270   :  { %v1784_v30 = vand.u32 4294901760, %v3759_v23  ;;  %v3776_v55 = vsub.f32 %v1694_v5, %v3762_v46 }
 0x271   :  { %v1471_v25 = vsub.f32 %v1381_v52, %v3654_v1  ;;  %v3779_v52 = vand.u32 4294901760, %v1693_v47  ;;  %v1780_v11 = vand.u32 4294901760, %v1779_v8 }
 0x272   :  { %v1343_v27 = vpop.f32.mrf.mxu2  ;;  %v1790_v61 = vand.u32 4294901760, %v3776_v55 }
 0x273   :  { %v1344_v45 = vadd.f32 %v1343_v27, %v1287_v60  ;;  %v1472_v34 = vand.u32 4294901760, %v1471_v25  ;;  %v1785_v60 = vsub.f32 %v3759_v23, %v1784_v30  ;;  %v3793_v27 = vand.u32 4294901760, %v1692_v19 }
 0x275   :  { %v1385_v15 = vadd.f32 %v1384_v3, %v1344_v45  ;;  %v1473_v62 = vsub.f32 %v1471_v25, %v1472_v34  ;;  %v1691_v45 = vld [vmem:[%s4106_s3 + $0x90] sm:$0xff]  ;;  %v1791_v3 = vsub.f32 %v3776_v55, %v1790_v61 }
 0x277   :  { %v1411_v13 = vand.u32 4294901760, %v1385_v15  ;;  %v1474_v10 = vand.u32 4294901760, %v1473_v62 }
 0x279   :  { %v1465_v32 = vsub.f32 %v1385_v15, %v1411_v13  ;;  %1412 = vmatpush.msra.mxu0 %v1411_v13  ;;  %1563 = vmatpush.msrb.mxu3 %v1411_v13 }
 0x27b   :  { %1414 = vmatpush.msra.mxu0 %v3654_v1  ;;  %1519 = vmatpush.msrb.mxu2 %v1465_v32  ;;  %v1466_v9 = vand.u32 4294901760, %v1465_v32 }
 0x27c   :  { %1565 = vmatpush.msrb.mxu3 %v3654_v1 }
 0x27d   :  { %1416 = vmatpush.msra.mxu0 %v3656_v41  ;;  %1522 = vmatpush.msrb.mxu2 %v1471_v25  ;;  %v1467_v58 = vsub.f32 %v1465_v32, %v1466_v9  ;;  %v1801_v25 = vsub.f32 %v1692_v19, %v3793_v27 }
 0x27e   :  { %1567 = vmatpush.msrb.mxu3 %v3656_v41 }
 0x27f   :  { %1418 = vmatpush.msra.mxu0 %v1417_v12  ;;  %1525 = vmatpush.msrb.mxu2 %v1477_v2  ;;  %v1468_v53 = vand.u32 4294901760, %v1467_v58  ;;  %v1792_v2 = vand.u32 4294901760, %v1791_v3 }
 0x280   :  { %1569 = vmatpush.msrb.mxu3 %v1417_v12  ;;  %1424 = vmatmul.f32.vlgmr.msra.gmra.mxu0 %v3675_v57 }
 0x281   :  { %1573 = vmatmul.f32.vlgmr.msrb.gmra.mxu3 %v3659_v22  ;;  %1610 = vmatpush.msrb.mxu0 %v1466_v9  ;;  %v1689_v9 = vld [vmem:[%s4106_s3 + $0x80] sm:$0xff] }
 0x282   :  { %1469 = vmatpush.msra.mxu1 %v1468_v53  ;;  %1528 = vmatpush.msrb.mxu2 %v1483_v16  ;;  %v1733_v53 = vand.u32 4294901760, %v1689_v9 }
 0x283   :  { %1531 = vmatmul.f32.vlgmr.msrb.gmra.mxu2 %v3652_v56  ;;  %1614 = vmatpush.msrb.mxu0 %v1472_v34  ;;  %v1802_v34 = vand.u32 4294901760, %v1801_v25 }
 0x284   :  { %1475 = vmatpush.msra.mxu1 %v1474_v10  ;;  %1720 = vmatpush.msra.mxu2 %v3742_v40 }
 0x285   :  { %1618 = vmatpush.msrb.mxu0 %v1478_v50  ;;  %1781 = vmatpush.msra.mxu3 %v1780_v11  ;;  %v1803_v10 = vsub.f32 %v1801_v25, %v1802_v34 }
 0x286   :  { %1481 = vmatpush.msra.mxu1 %v1480_v59  ;;  %1722 = vmatpush.msra.mxu2 %v3750_v26  ;;  %v1819_v59 = vsub.f32 %v1689_v9, %v1733_v53 }
 0x287   :  { %1622 = vmatpush.msrb.mxu0 %v1484_v49 }
 0x288   :  { %1487 = vmatpush.msra.mxu1 %v1486_v37  ;;  %1432 = vmatmul.f32.gmra.mxu0 %v3696_v14  ;;  %v1804_v37 = vand.u32 4294901760, %v1803_v10  ;;  %v1820_v36 = vand.u32 4294901760, %v1819_v59 }
 0x289   :  { %1489 = vmatmul.f32.vlgmr.msra.gmra.mxu1 %v3648_v21  ;;  %1579 = vmatmul.f32.gmra.mxu3 %v3682_v4 }
 0x28a   :  { %1653 = vmatpush.msrb.mxu1 %v1411_v13  ;;  %1851 = vmatpush.msra.mxu0 %v3748_v20  ;;  %v1690_v13 = vld [vmem:[%s4106_s3 + $0x88] sm:$0xff]  ;;  %v1821_v5 = vsub.f32 %v1819_v59, %v1820_v36 }
 0x28b   :  { %1536 = vmatmul.f32.gmra.mxu2 %v3670_v33  ;;  %v1731_v16 = vand.u32 4294901760, %v1690_v13 }
 0x28c   :  { %1655 = vmatpush.msrb.mxu1 %v3654_v1  ;;  %1854 = vmatpush.msra.mxu0 %v3759_v23  ;;  %v1795_v1 = vsub.f32 %v1693_v47, %v3779_v52  ;;  %v1822_v8 = vand.u32 4294901760, %v1821_v5 }
 0x28d   :  { %1724 = vmatpush.msra.mxu2 %v3762_v46  ;;  %v1813_v49 = vsub.f32 %v1690_v13, %v1731_v16 }
 0x28e   :  { %1657 = vmatpush.msrb.mxu1 %v3656_v41  ;;  %1857 = vmatpush.msra.mxu0 %v3776_v55  ;;  %v1786_v41 = vand.u32 4294901760, %v1785_v60  ;;  %v1796_v15 = vand.u32 4294901760, %v1795_v1 }
 0x28f   :  { %1726 = vmatpush.msra.mxu2 %v3779_v52  ;;  %v1814_v28 = vand.u32 4294901760, %v1813_v49 }
 0x290   :  { %1659 = vmatpush.msrb.mxu1 %v1417_v12  ;;  %1440 = vmatmul.f32.gmra.mxu0 %v3713_v18  ;;  %v3800_v12 = vand.u32 4294901760, %v1691_v45  ;;  %v1797_v32 = vsub.f32 %v1795_v1, %v1796_v15 }
 0x291   :  { %1493 = vmatmul.f32.gmra.mxu1 %v3662_v24  ;;  %1585 = vmatmul.f32.gmra.mxu3 %v3699_v38  ;;  %v1815_v39 = vsub.f32 %v1813_v49, %v1814_v28 }
 0x292   :  { %1903 = vmatpush.msra.mxu1 %v3742_v40  ;;  %1860 = vmatpush.msra.mxu0 %v1795_v1  ;;  %v1807_v51 = vsub.f32 %v1691_v45, %v3800_v12  ;;  %v1798_v58 = vand.u32 4294901760, %v1797_v32 }
 0x293   :  { %1541 = vmatmul.f32.gmra.mxu2 %v3688_v54  ;;  %1787 = vmatpush.msra.mxu3 %v1786_v41  ;;  %v1816_v42 = vand.u32 4294901760, %v1815_v39 }
 0x294   :  { %1905 = vmatpush.msra.mxu1 %v3750_v26  ;;  %1728 = vmatpush.msra.mxu2 %v3793_v27  ;;  %v1808_v62 = vand.u32 4294901760, %v1807_v51 }
 0x295   :  { %1863 = vmatpush.msra.mxu0 %v1801_v25  ;;  %1793 = vmatpush.msra.mxu3 %v1792_v2 }
 0x296   :  { %1907 = vmatpush.msra.mxu1 %v3762_v46  ;;  %1730 = vmatpush.msra.mxu2 %v3800_v12  ;;  %v1809_v17 = vsub.f32 %v1807_v51, %v1808_v62 }
 0x297   :  { %1866 = vmatpush.msra.mxu0 %v1807_v51  ;;  %1799 = vmatpush.msra.mxu3 %v1798_v58 }
 0x298   :  { %1448 = vmatmul.f32.gmra.mxu0 %v3724_v48  ;;  %1909 = vmatpush.msra.mxu1 %v3779_v52  ;;  %v1810_v29 = vand.u32 4294901760, %v1809_v17 }
 0x299   :  { %1497 = vmatmul.f32.gmra.mxu1 %v3678_v7  ;;  %1591 = vmatmul.f32.gmra.mxu3 %v3716_v35 }
 0x29a   :  { %1911 = vmatpush.msra.mxu1 %v3793_v27  ;;  %1732 = vmatpush.msra.mxu2 %v1731_v16 }
 0x29b   :  { %1546 = vmatmul.f32.gmra.mxu2 %v3706_v31  ;;  %1869 = vmatpush.msra.mxu0 %v1813_v49 }
 0x29c   :  { %1913 = vmatpush.msra.mxu1 %v3800_v12  ;;  %1734 = vmatpush.msra.mxu2 %v1733_v53 }
 0x29d   :  { %1805 = vmatpush.msra.mxu3 %v1804_v37  ;;  %1872 = vmatpush.msra.mxu0 %v1819_v59 }
 0x29e   :  { %1915 = vmatpush.msra.mxu1 %v1731_v16  ;;  %1954 = vmatpush.msrb.mxu2 %v1778_v43 }
 0x29f   :  { %1811 = vmatpush.msra.mxu3 %v1810_v29 }
 0x2a0   :  { %1624 = vmatmul.f32.vlgmr.msrb.gmra.mxu0 %v3648_v21  ;;  %1917 = vmatpush.msra.mxu1 %v1733_v53 }
 0x2a1   :  { %1501 = vmatmul.f32.gmra.mxu1 %v3694_v6  ;;  %1958 = vmatpush.msrb.mxu2 %v1784_v30 }
 0x2a2   :  { %1817 = vmatpush.msra.mxu3 %v1816_v42 }
 0x2a3   :  { %1962 = vmatpush.msrb.mxu2 %v1790_v61 }
 0x2a4   :  { %1823 = vmatpush.msra.mxu3 %v1822_v8 }
 0x2a5   :  { %1966 = vmatpush.msrb.mxu2 %v1796_v15 }
 0x2a6   :  { %2009 = vmatpush.msrb.mxu3 %v3742_v40 }
 0x2a7   :  { %1970 = vmatpush.msrb.mxu2 %v1802_v34 }
 0x2a8   :  { %1628 = vmatmul.f32.gmra.mxu0 %v3662_v24  ;;  %2011 = vmatpush.msrb.mxu3 %v3750_v26 }
 0x2a9   :  { %1661 = vmatmul.f32.vlgmr.msrb.gmra.mxu1 %v3648_v21  ;;  %1974 = vmatpush.msrb.mxu2 %v1808_v62 }
 0x2aa   :  { %2013 = vmatpush.msrb.mxu3 %v3762_v46 }
 0x2ab   :  { %1978 = vmatpush.msrb.mxu2 %v1814_v28 }
 0x2ac   :  { %2015 = vmatpush.msrb.mxu3 %v3779_v52 }
 0x2ad   :  { %1982 = vmatpush.msrb.mxu2 %v1820_v36 }
 0x2ae   :  { %2017 = vmatpush.msrb.mxu3 %v3793_v27 }
 0x2b0   :  { %1632 = vmatmul.f32.gmra.mxu0 %v3678_v7  ;;  %2019 = vmatpush.msrb.mxu3 %v3800_v12 }
 0x2b1   :  { %1665 = vmatmul.f32.gmra.mxu1 %v3662_v24 }
 0x2b2   :  { %2021 = vmatpush.msrb.mxu3 %v1731_v16 }
 0x2b4   :  { %2023 = vmatpush.msrb.mxu3 %v1733_v53 }
 0x2b8   :  { %1636 = vmatmul.f32.gmra.mxu0 %v3694_v6 }
 0x2b9   :  { %1669 = vmatmul.f32.gmra.mxu1 %v3678_v7 }
 0x2c1   :  { %1673 = vmatmul.f32.gmra.mxu1 %v3694_v6 }
 0x2fd   :  { %v3769_v0 = vpop.f32.mrf.mxu0 }
 0x304   :  { %v1574_v23 = vpop.f32.mrf.mxu3 }
 0x305   :  { %v1433_v50 = vpop.f32.mrf.mxu0 }
 0x306   :  { %v1490_v63 = vpop.f32.mrf.mxu1  ;;  %v1532_v43 = vpop.f32.mrf.mxu2 }
 0x307   :  { %v1491_v30 = vadd.f32 %v1490_v63, %v3769_v0 }
 0x309   :  { %v1533_v11 = vadd.f32 %v1532_v43, %v1491_v30 }
 0x30b   :  { %v1575_v61 = vadd.f32 %v1574_v23, %v1533_v11 }
 0x30c   :  { %v1580_v1 = vpop.f32.mrf.mxu3 }
 0x30d   :  { %v1441_v47 = vpop.f32.mrf.mxu0 }
 0x30e   :  { %v1494_v55 = vpop.f32.mrf.mxu1  ;;  %v1537_v46 = vpop.f32.mrf.mxu2 }
 0x30f   :  { %v1495_v60 = vadd.f32 %v1494_v55, %v1433_v50 }
 0x311   :  { %v1538_v3 = vadd.f32 %v1537_v46, %v1495_v60 }
 0x313   :  { %v1581_v0 = vadd.f32 %v1580_v1, %v1538_v3 }
 0x314   :  { %v1586_v58 = vpop.f32.mrf.mxu3 }
 0x315   :  { %v1449_v19 = vpop.f32.mrf.mxu0 }
 0x316   :  { %v1498_v20 = vpop.f32.mrf.mxu1  ;;  %v1542_v12 = vpop.f32.mrf.mxu2 }
 0x317   :  { %v1499_v25 = vadd.f32 %v1498_v20, %v1441_v47 }
 0x319   :  { %v1543_v34 = vadd.f32 %v1542_v12, %v1499_v25 }
 0x31b   :  { %v1587_v17 = vadd.f32 %v1586_v58, %v1543_v34 }
 0x31c   :  { %v1592_v20 = vpop.f32.mrf.mxu3 }
 0x31d   :  { %v1625_v40 = vpop.f32.mrf.mxu0 }
 0x31e   :  { %v1502_v26 = vpop.f32.mrf.mxu1  ;;  %v1626_v52 = vadd.f32 %v1625_v40, %v1575_v61  ;;  %v1547_v36 = vpop.f32.mrf.mxu2 }
 0x31f   :  { %v1503_v63 = vadd.f32 %v1502_v26, %v1449_v19 }
 0x321   :  { %v1548_v5 = vadd.f32 %v1547_v36, %v1503_v63 }
 0x323   :  { %v1593_v23 = vadd.f32 %v1592_v20, %v1548_v5 }
 0x325   :  { %v1629_v45 = vpop.f32.mrf.mxu0 }
 0x326   :  { %v1662_v41 = vpop.f32.mrf.mxu1  ;;  %v1630_v32 = vadd.f32 %v1629_v45, %v1581_v0 }
 0x327   :  { %v1663_v27 = vadd.f32 %v1662_v41, %v1626_v52 }
 0x329   :  { %vm1677_vm5 = vcmp.ge.f32.partialorder %v1663_v27, 0.0  ;;  %v1681_v15 = vmul.f32 0.2, %v1663_v27 }
 0x32b   :  { %v1685_v13 = vsel %vm1677_vm5, %v1663_v27, %v1681_v15 }
 0x32c   :  { %v1700_v2 = vsel %vm389_vm10, %v1685_v13, 0 }
 0x32d   :  { %v3826_v51 = vand.u32 4294901760, %v1700_v2  ;;  %v1633_v62 = vpop.f32.mrf.mxu0 }
 0x32e   :  { %v1666_v16 = vpop.f32.mrf.mxu1  ;;  %v1634_v37 = vadd.f32 %v1633_v62, %v1587_v17 }
 0x32f   :  { %v1736_v9 = vsub.f32 %v1700_v2, %v3826_v51  ;;  %v1667_v50 = vadd.f32 %v1666_v16, %v1630_v32  ;;  %1825 = vmatmul.f32.vlgmr.msra.gmra.mxu3 %v3826_v51 }
 0x331   :  { %v1737_v49 = vand.u32 4294901760, %v1736_v9  ;;  %vm1678_vm6 = vcmp.ge.f32.partialorder %v1667_v50, 0.0  ;;  %v1682_v53 = vmul.f32 0.2, %v1667_v50  ;;  %1875 = vmatmul.f32.vlgmr.msra.gmra.mxu0 %v1736_v9 }
 0x333   :  { %v1738_v10 = vsub.f32 %v1736_v9, %v1737_v49  ;;  %v1686_v28 = vsel %vm1678_vm6, %v1667_v50, %v1682_v53  ;;  %1921 = vmatmul.f32.vlgmr.msra.gmra.mxu1 %v1737_v49 }
 0x334   :  { %v1703_v59 = vsel %vm389_vm10, %v1686_v28, 0 }
 0x335   :  { %v1743_v29 = vand.u32 4294901760, %v1703_v59  ;;  %v1739_v39 = vand.u32 4294901760, %v1738_v10  ;;  %v1637_v43 = vpop.f32.mrf.mxu0 }
 0x336   :  { %v1670_v42 = vpop.f32.mrf.mxu1  ;;  %v1638_v11 = vadd.f32 %v1637_v43, %v1593_v23 }
 0x337   :  { %v1671_v47 = vadd.f32 %v1670_v42, %v1634_v37  ;;  %1740 = vmatmul.f32.vlgmr.msra.gmra.mxu2 %v1739_v39  ;;  %1829 = vmatmul.f32.gmra.mxu3 %v1743_v29  ;;  %v1744_v8 = vsub.f32 %v1703_v59, %v1743_v29 }
 0x339   :  { %vm1679_vm7 = vcmp.ge.f32.partialorder %v1671_v47, 0.0  ;;  %v1683_v55 = vmul.f32 0.2, %v1671_v47  ;;  %1880 = vmatmul.f32.gmra.mxu0 %v1744_v8  ;;  %v1745_v19 = vand.u32 4294901760, %v1744_v8 }
 0x33b   :  { %v1687_v30 = vsel %vm1679_vm7, %v1671_v47, %v1683_v55  ;;  %1927 = vmatmul.f32.gmra.mxu1 %v1745_v19  ;;  %v1746_v40 = vsub.f32 %v1744_v8, %v1745_v19 }
 0x33c   :  { %v1706_v26 = vsel %vm389_vm10, %v1687_v30, 0 }
 0x33d   :  { %v1751_v46 = vand.u32 4294901760, %v1706_v26  ;;  %v1747_v60 = vand.u32 4294901760, %v1746_v40 }
 0x33e   :  { %v1674_v61 = vpop.f32.mrf.mxu1 }
 0x33f   :  { %v1675_v1 = vadd.f32 %v1674_v61, %v1638_v11  ;;  %1748 = vmatmul.f32.gmra.mxu2 %v1747_v60  ;;  %1833 = vmatmul.f32.gmra.mxu3 %v1751_v46  ;;  %v1752_v52 = vsub.f32 %v1706_v26, %v1751_v46 }
 0x341   :  { %vm1680_vm8 = vcmp.ge.f32.partialorder %v1675_v1, 0.0  ;;  %v1684_v45 = vmul.f32 0.2, %v1675_v1  ;;  %1885 = vmatmul.f32.gmra.mxu0 %v1752_v52  ;;  %v1753_v41 = vand.u32 4294901760, %v1752_v52 }
 0x343   :  { %v1688_v3 = vsel %vm1680_vm8, %v1675_v1, %v1684_v45  ;;  %1933 = vmatmul.f32.gmra.mxu1 %v1753_v41  ;;  %v1754_v27 = vsub.f32 %v1752_v52, %v1753_v41 }
 0x344   :  { %v1709_v15 = vsel %vm389_vm10, %v1688_v3, 0 }
 0x345   :  { %v1759_v25 = vand.u32 4294901760, %v1709_v15  ;;  %v1755_v0 = vand.u32 4294901760, %v1754_v27 }
 0x347   :  { %1756 = vmatmul.f32.gmra.mxu2 %v1755_v0  ;;  %1837 = vmatmul.f32.gmra.mxu3 %v1759_v25  ;;  %v1760_v13 = vsub.f32 %v1709_v15, %v1759_v25 }
 0x349   :  { %1890 = vmatmul.f32.gmra.mxu0 %v1760_v13  ;;  %v1761_v12 = vand.u32 4294901760, %v1760_v13 }
 0x34b   :  { %1939 = vmatmul.f32.gmra.mxu1 %v1761_v12  ;;  %v1762_v2 = vsub.f32 %v1760_v13, %v1761_v12 }
 0x34d   :  { %v1763_v32 = vand.u32 4294901760, %v1762_v2 }
 0x34f   :  { %1764 = vmatmul.f32.gmra.mxu2 %v1763_v32  ;;  %2025 = vmatmul.f32.vlgmr.msrb.gmra.mxu3 %v3826_v51 }
 0x357   :  { %1984 = vmatmul.f32.vlgmr.msrb.gmra.mxu2 %v3826_v51  ;;  %2029 = vmatmul.f32.gmra.mxu3 %v1743_v29  ;;  %v3055_v51 = vld [vmem:[%s4106_s3 + $0x150] ss:$0 sm:$0xff] }
 0x35f   :  { %1988 = vmatmul.f32.gmra.mxu2 %v1743_v29  ;;  %2033 = vmatmul.f32.gmra.mxu3 %v1751_v46 }
 0x367   :  { %1992 = vmatmul.f32.gmra.mxu2 %v1751_v46  ;;  %2037 = vmatmul.f32.gmra.mxu3 %v1759_v25 }
 0x36f   :  { %1996 = vmatmul.f32.gmra.mxu2 %v1759_v25 }
 0x3ae   :  { %v1876_v53 = vpop.f32.mrf.mxu0 }
 0x3b0   :  { %v1922_v63 = vpop.f32.mrf.mxu1 }
 0x3b2   :  { %v1826_v16 = vpop.f32.mrf.mxu3 }
 0x3b6   :  { %v1881_v28 = vpop.f32.mrf.mxu0 }
 0x3b8   :  { %v1928_v37 = vpop.f32.mrf.mxu1 }
 0x3ba   :  { %v1741_v34 = vpop.f32.mrf.mxu2  ;;  %v1830_v9 = vpop.f32.mrf.mxu3 }
 0x3bb   :  { %v1742_v36 = vadd.f32 %v3055_v51, %v1741_v34 }
 0x3bd   :  { %v1827_v19 = vadd.f32 %v1826_v16, %v1742_v36 }
 0x3be   :  { %v1886_v47 = vpop.f32.mrf.mxu0 }
 0x3bf   :  { %v1877_v40 = vadd.f32 %v1876_v53, %v1827_v19 }
 0x3c0   :  { %v1934_v23 = vpop.f32.mrf.mxu1 }
 0x3c1   :  { %v1923_v45 = vadd.f32 %v1922_v63, %v1877_v40 }
 0x3c2   :  { %v1749_v50 = vpop.f32.mrf.mxu2  ;;  %v1834_v58 = vpop.f32.mrf.mxu3 }
 0x3c3   :  { %v1750_v39 = vadd.f32 %v3055_v51, %v1749_v50 }
 0x3c5   :  { %v1831_v8 = vadd.f32 %v1830_v9, %v1750_v39 }
 0x3c6   :  { %v1891_v52 = vpop.f32.mrf.mxu0 }
 0x3c7   :  { %v1882_v30 = vadd.f32 %v1881_v28, %v1831_v8 }
 0x3c8   :  { %v1940_v25 = vpop.f32.mrf.mxu1 }
 0x3c9   :  { %v1929_v46 = vadd.f32 %v1928_v37, %v1882_v30  ;;  %v2345_v30 = vld [vmem:[%s4106_s3 + $0xd0] sm:$0xff] }
 0x3ca   :  { %v1757_v62 = vpop.f32.mrf.mxu2  ;;  %v1838_v49 = vpop.f32.mrf.mxu3 }
 0x3cb   :  { %v1758_v29 = vadd.f32 %v3055_v51, %v1757_v62 }
 0x3cd   :  { %v1835_v5 = vadd.f32 %v1834_v58, %v1758_v29 }
 0x3cf   :  { %v1887_v43 = vadd.f32 %v1886_v47, %v1835_v5 }
 0x3d1   :  { %v1935_v11 = vadd.f32 %v1934_v23, %v1887_v43 }
 0x3d2   :  { %v1765_v10 = vpop.f32.mrf.mxu2  ;;  %v2026_v17 = vpop.f32.mrf.mxu3 }
 0x3d3   :  { %v1766_v20 = vadd.f32 %v3055_v51, %v1765_v10 }
 0x3d5   :  { %v1839_v26 = vadd.f32 %v1838_v49, %v1766_v20 }
 0x3d7   :  { %v1892_v3 = vadd.f32 %v1891_v52, %v1839_v26 }
 0x3d9   :  { %v1941_v13 = vadd.f32 %v1940_v25, %v1892_v3 }
 0x3da   :  { %v1985_v59 = vpop.f32.mrf.mxu2  ;;  %v2030_v42 = vpop.f32.mrf.mxu3 }
 0x3db   :  { %v1986_v27 = vadd.f32 %v1985_v59, %v1923_v45 }
 0x3dd   :  { %v2027_v12 = vadd.f32 %v2026_v17, %v1986_v27 }
 0x3df   :  { %v2059_v58 = vand.u32 4294901760, %v2027_v12 }
 0x3e1   :  { %v2125_v63 = vsub.f32 %v2027_v12, %v2059_v58 }
 0x3e2   :  { %v1989_v55 = vpop.f32.mrf.mxu2  ;;  %v2034_v60 = vpop.f32.mrf.mxu3 }
 0x3e3   :  { %v1990_v41 = vadd.f32 %v1989_v55, %v1929_v46  ;;  %v2126_v29 = vand.u32 4294901760, %v2125_v63  ;;  %v3923_v46 = vand.u32 4294901760, %v2345_v30 }
 0x3e5   :  { %v2031_v0 = vadd.f32 %v2030_v42, %v1990_v41  ;;  %v2127_v5 = vsub.f32 %v2125_v63, %v2126_v29  ;;  %v2459_v45 = vsub.f32 %v2345_v30, %v3923_v46 }
 0x3e7   :  { %v2057_v34 = vand.u32 4294901760, %v2031_v0  ;;  %v2128_v8 = vand.u32 4294901760, %v2127_v5 }
 0x3e9   :  { %v2119_v53 = vsub.f32 %v2031_v0, %v2057_v34 }
 0x3ea   :  { %v1993_v61 = vpop.f32.mrf.mxu2  ;;  %v2038_v9 = vpop.f32.mrf.mxu3 }
 0x3eb   :  { %v1994_v1 = vadd.f32 %v1993_v61, %v1935_v11  ;;  %v2120_v17 = vand.u32 4294901760, %v2119_v53  ;;  %v2344_v61 = vld [vmem:[%s4106_s3 + $0xc8] sm:$0xff] }
 0x3ec   :  { %v2383_v41 = vand.u32 4294901760, %v2344_v61 }
 0x3ed   :  { %v2035_v15 = vadd.f32 %v2034_v60, %v1994_v1  ;;  %v2121_v36 = vsub.f32 %v2119_v53, %v2120_v17 }
 0x3ee   :  { %v2465_v12 = vsub.f32 %v2344_v61, %v2383_v41 }
 0x3ef   :  { %v2055_v2 = vand.u32 4294901760, %v2035_v15  ;;  %v2122_v47 = vand.u32 4294901760, %v2121_v36 }
 0x3f1   :  { %v2113_v62 = vsub.f32 %v2035_v15, %v2055_v2  ;;  %v2343_v15 = vld [vmem:[%s4106_s3 + $0xc0] sm:$0xff] }
 0x3f2   :  { %v1997_v32 = vpop.f32.mrf.mxu2 }
 0x3f3   :  { %v1998_v16 = vadd.f32 %v1997_v32, %v1941_v13  ;;  %v2114_v28 = vand.u32 4294901760, %v2113_v62  ;;  %v2460_v13 = vand.u32 4294901760, %v2459_v45 }
 0x3f5   :  { %v2039_v50 = vadd.f32 %v2038_v9, %v1998_v16  ;;  %v2115_v37 = vsub.f32 %v2113_v62, %v2114_v28  ;;  %v2461_v16 = vsub.f32 %v2459_v45, %v2460_v13 }
 0x3f7   :  { %v2053_v49 = vand.u32 4294901760, %v2039_v50  ;;  %v2116_v42 = vand.u32 4294901760, %v2115_v37 }
 0x3f9   :  { %v2107_v10 = vsub.f32 %v2039_v50, %v2053_v49  ;;  %2054 = vmatpush.msrb.mxu0 %v2053_v49  ;;  %2205 = vmatpush.msra.mxu3 %v2053_v49 }
 0x3fb   :  { %2056 = vmatpush.msrb.mxu0 %v2055_v2  ;;  %2161 = vmatpush.msra.mxu2 %v2107_v10  ;;  %v2108_v59 = vand.u32 4294901760, %v2107_v10 }
 0x3fc   :  { %2207 = vmatpush.msra.mxu3 %v2055_v2 }
 0x3fd   :  { %2058 = vmatpush.msrb.mxu0 %v2057_v34  ;;  %2164 = vmatpush.msra.mxu2 %v2113_v62  ;;  %v2109_v51 = vsub.f32 %v2107_v10, %v2108_v59 }
 0x3fe   :  { %2209 = vmatpush.msra.mxu3 %v2057_v34 }
 0x3ff   :  { %2060 = vmatpush.msrb.mxu0 %v2059_v58  ;;  %2167 = vmatpush.msra.mxu2 %v2119_v53  ;;  %v2110_v39 = vand.u32 4294901760, %v2109_v51 }
 0x400   :  { %2211 = vmatpush.msra.mxu3 %v2059_v58  ;;  %2066 = vmatmul.f32.vlgmr.msrb.gmra.mxu0 %v3675_v57  ;;  %v2348_v57 = vld [vmem:[%s4106_s3 + $0xe8] sm:$0xff] }
 0x401   :  { %2215 = vmatmul.f32.vlgmr.msra.gmra.mxu3 %v3659_v22  ;;  %2252 = vmatpush.msra.mxu0 %v2108_v59 }
 0x402   :  { %2111 = vmatpush.msrb.mxu1 %v2110_v39  ;;  %2170 = vmatpush.msra.mxu2 %v2125_v63 }
 0x403   :  { %2173 = vmatmul.f32.vlgmr.msra.gmra.mxu2 %v3652_v56  ;;  %2256 = vmatpush.msra.mxu0 %v2114_v28  ;;  %v2350_v56 = vld [vmem:[%s4106_s3 + $0xf8] sm:$0xff] }
 0x404   :  { %2117 = vmatpush.msrb.mxu1 %v2116_v42  ;;  %v3865_v22 = vand.u32 4294901760, %v2350_v56 }
 0x405   :  { %2260 = vmatpush.msra.mxu0 %v2120_v17 }
 0x406   :  { %2123 = vmatpush.msrb.mxu1 %v2122_v47  ;;  %2372 = vmatpush.msrb.mxu2 %v3865_v22 }
 0x407   :  { %2264 = vmatpush.msra.mxu0 %v2126_v29 }
 0x408   :  { %2129 = vmatpush.msrb.mxu1 %v2128_v8  ;;  %2074 = vmatmul.f32.gmra.mxu0 %v3696_v14  ;;  %v2347_v14 = vld [vmem:[%s4106_s3 + $0xe0] sm:$0xff] }
 0x409   :  { %2131 = vmatmul.f32.vlgmr.msrb.gmra.mxu1 %v3648_v21  ;;  %2221 = vmatmul.f32.gmra.mxu3 %v3682_v4 }
 0x40a   :  { %2295 = vmatpush.msra.mxu1 %v2053_v49 }
 0x40b   :  { %2178 = vmatmul.f32.gmra.mxu2 %v3670_v33  ;;  %v3871_v33 = vsub.f32 %v2350_v56, %v3865_v22 }
 0x40c   :  { %2297 = vmatpush.msra.mxu1 %v2055_v2  ;;  %v2385_v2 = vand.u32 4294901760, %v2343_v15 }
 0x40d   :  { %2503 = vmatpush.msrb.mxu0 %v3871_v33 }
 0x40e   :  { %2299 = vmatpush.msra.mxu1 %v2057_v34  ;;  %v2466_v34 = vand.u32 4294901760, %v2465_v12  ;;  %v2471_v9 = vsub.f32 %v2343_v15, %v2385_v2 }
 0x410   :  { %2301 = vmatpush.msra.mxu1 %v2059_v58  ;;  %2082 = vmatmul.f32.gmra.mxu0 %v3713_v18  ;;  %v2462_v58 = vand.u32 4294901760, %v2461_v16  ;;  %v2467_v62 = vsub.f32 %v2465_v12, %v2466_v34  ;;  %v2472_v49 = vand.u32 4294901760, %v2471_v9 }
 0x411   :  { %2135 = vmatmul.f32.gmra.mxu1 %v3662_v24  ;;  %2227 = vmatmul.f32.gmra.mxu3 %v3699_v38 }
 0x412   :  { %2555 = vmatpush.msrb.mxu1 %v3865_v22  ;;  %v2468_v53 = vand.u32 4294901760, %v2467_v62  ;;  %v2473_v10 = vsub.f32 %v2471_v9, %v2472_v49 }
 0x413   :  { %2183 = vmatmul.f32.gmra.mxu2 %v3688_v54  ;;  %v3885_v54 = vand.u32 4294901760, %v2348_v57 }
 0x414   :  { %v2474_v59 = vand.u32 4294901760, %v2473_v10 }
 0x415   :  { %v3899_v18 = vsub.f32 %v2348_v57, %v3885_v54 }
 0x417   :  { %v2442_v20 = vand.u32 4294901760, %v3899_v18 }
 0x418   :  { %2090 = vmatmul.f32.gmra.mxu0 %v3724_v48  ;;  %v2346_v48 = vld [vmem:[%s4106_s3 + $0xd8] sm:$0xff] }
 0x419   :  { %2139 = vmatmul.f32.gmra.mxu1 %v3678_v7  ;;  %2233 = vmatmul.f32.gmra.mxu3 %v3716_v35  ;;  %v3902_v35 = vand.u32 4294901760, %v2347_v14  ;;  %v3916_v23 = vand.u32 4294901760, %v2346_v48  ;;  %v2443_v26 = vsub.f32 %v3899_v18, %v2442_v20 }
 0x41b   :  { %2188 = vmatmul.f32.gmra.mxu2 %v3706_v31  ;;  %v2447_v43 = vsub.f32 %v2347_v14, %v3902_v35  ;;  %v2453_v60 = vsub.f32 %v2346_v48, %v3916_v23  ;;  %v2444_v1 = vand.u32 4294901760, %v2443_v26 }
 0x41d   :  { %v2448_v11 = vand.u32 4294901760, %v2447_v43  ;;  %v2454_v27 = vand.u32 4294901760, %v2453_v60 }
 0x41f   :  { %v2449_v52 = vsub.f32 %v2447_v43, %v2448_v11  ;;  %v2455_v32 = vsub.f32 %v2453_v60, %v2454_v27 }
 0x420   :  { %2266 = vmatmul.f32.vlgmr.msra.gmra.mxu0 %v3648_v21 }
 0x421   :  { %2143 = vmatmul.f32.gmra.mxu1 %v3694_v6  ;;  %v2450_v0 = vand.u32 4294901760, %v2449_v52  ;;  %v2456_v50 = vand.u32 4294901760, %v2455_v32 }
 0x428   :  { %2270 = vmatmul.f32.gmra.mxu0 %v3662_v24 }
 0x429   :  { %2303 = vmatmul.f32.vlgmr.msra.gmra.mxu1 %v3648_v21  ;;  %v2349_v21 = vld [vmem:[%s4106_s3 + $0xf0] sm:$0xff] }
 0x430   :  { %2274 = vmatmul.f32.gmra.mxu0 %v3678_v7 }
 0x431   :  { %2307 = vmatmul.f32.gmra.mxu1 %v3662_v24  ;;  %v3873_v24 = vand.u32 4294901760, %v2349_v21 }
 0x433   :  { %v3882_v4 = vsub.f32 %v2349_v21, %v3873_v24  ;;  %2557 = vmatpush.msrb.mxu1 %v3873_v24  ;;  %2374 = vmatpush.msrb.mxu2 %v3873_v24 }
 0x435   :  { %v2436_v31 = vand.u32 4294901760, %v3882_v4  ;;  %2506 = vmatpush.msrb.mxu0 %v3882_v4  ;;  %2559 = vmatpush.msrb.mxu1 %v3885_v54 }
 0x436   :  { %2376 = vmatpush.msrb.mxu2 %v3885_v54 }
 0x437   :  { %v2437_v19 = vsub.f32 %v3882_v4, %v2436_v31  ;;  %2509 = vmatpush.msrb.mxu0 %v3899_v18  ;;  %2561 = vmatpush.msrb.mxu1 %v3902_v35 }
 0x438   :  { %2278 = vmatmul.f32.gmra.mxu0 %v3694_v6  ;;  %2378 = vmatpush.msrb.mxu2 %v3902_v35 }
 0x439   :  { %2311 = vmatmul.f32.gmra.mxu1 %v3678_v7  ;;  %v2430_v7 = vand.u32 4294901760, %v3871_v33  ;;  %v2438_v40 = vand.u32 4294901760, %v2437_v19  ;;  %2512 = vmatpush.msrb.mxu0 %v2447_v43 }
 0x43a   :  { %2563 = vmatpush.msrb.mxu1 %v3916_v23  ;;  %2380 = vmatpush.msrb.mxu2 %v3916_v23 }
 0x43b   :  { %v2431_v38 = vsub.f32 %v3871_v33, %v2430_v7  ;;  %2515 = vmatpush.msrb.mxu0 %v2453_v60 }
 0x43c   :  { %2565 = vmatpush.msrb.mxu1 %v3923_v46  ;;  %2382 = vmatpush.msrb.mxu2 %v3923_v46 }
 0x43d   :  { %v2432_v55 = vand.u32 4294901760, %v2431_v38  ;;  %2518 = vmatpush.msrb.mxu0 %v2459_v45 }
 0x43e   :  { %2567 = vmatpush.msrb.mxu1 %v2383_v41  ;;  %2384 = vmatpush.msrb.mxu2 %v2383_v41 }
 0x43f   :  { %2433 = vmatpush.msrb.mxu3 %v2432_v55  ;;  %2521 = vmatpush.msrb.mxu0 %v2465_v12 }
 0x440   :  { %2569 = vmatpush.msrb.mxu1 %v2385_v2  ;;  %2386 = vmatpush.msrb.mxu2 %v2385_v2 }
 0x441   :  { %2315 = vmatmul.f32.gmra.mxu1 %v3694_v6  ;;  %2439 = vmatpush.msrb.mxu3 %v2438_v40 }
 0x442   :  { %2524 = vmatpush.msrb.mxu0 %v2471_v9  ;;  %2606 = vmatpush.msra.mxu2 %v2430_v7 }
 0x443   :  { %2445 = vmatpush.msrb.mxu3 %v2444_v1 }
 0x444   :  { %2610 = vmatpush.msra.mxu2 %v2436_v31 }
 0x445   :  { %2451 = vmatpush.msrb.mxu3 %v2450_v0 }
 0x446   :  { %2614 = vmatpush.msra.mxu2 %v2442_v20 }
 0x447   :  { %2457 = vmatpush.msrb.mxu3 %v2456_v50 }
 0x448   :  { %2618 = vmatpush.msra.mxu2 %v2448_v11 }
 0x449   :  { %2463 = vmatpush.msrb.mxu3 %v2462_v58 }
 0x44a   :  { %2622 = vmatpush.msra.mxu2 %v2454_v27 }
 0x44b   :  { %2469 = vmatpush.msrb.mxu3 %v2468_v53 }
 0x44c   :  { %2626 = vmatpush.msra.mxu2 %v2460_v13 }
 0x44d   :  { %2475 = vmatpush.msrb.mxu3 %v2474_v59 }
 0x44e   :  { %2630 = vmatpush.msra.mxu2 %v2466_v34 }
 0x44f   :  { %2661 = vmatpush.msra.mxu3 %v3865_v22 }
 0x450   :  { %2634 = vmatpush.msra.mxu2 %v2472_v49 }
 0x451   :  { %2663 = vmatpush.msra.mxu3 %v3873_v24 }
 0x453   :  { %2665 = vmatpush.msra.mxu3 %v3885_v54 }
 0x455   :  { %2667 = vmatpush.msra.mxu3 %v3902_v35 }
 0x457   :  { %2669 = vmatpush.msra.mxu3 %v3916_v23 }
 0x459   :  { %2671 = vmatpush.msra.mxu3 %v3923_v46 }
 0x45b   :  { %2673 = vmatpush.msra.mxu3 %v2383_v41 }
 0x45d   :  { %2675 = vmatpush.msra.mxu3 %v2385_v2 }
 0x47d   :  { %v3888_v6 = vpop.f32.mrf.mxu0 }
 0x484   :  { %v2216_v29 = vpop.f32.mrf.mxu3 }
 0x485   :  { %v2075_v3 = vpop.f32.mrf.mxu0 }
 0x486   :  { %v2132_v25 = vpop.f32.mrf.mxu1  ;;  %v2174_v37 = vpop.f32.mrf.mxu2 }
 0x487   :  { %v2133_v39 = vadd.f32 %v2132_v25, %v3888_v6 }
 0x489   :  { %v2175_v5 = vadd.f32 %v2174_v37, %v2133_v39 }
 0x48b   :  { %v2217_v56 = vadd.f32 %v2216_v29, %v2175_v5 }
 0x48c   :  { %v2222_v22 = vpop.f32.mrf.mxu3 }
 0x48d   :  { %v2083_v63 = vpop.f32.mrf.mxu0 }
 0x48e   :  { %v2136_v28 = vpop.f32.mrf.mxu1  ;;  %v2179_v47 = vpop.f32.mrf.mxu2 }
 0x48f   :  { %v2137_v8 = vadd.f32 %v2136_v28, %v2075_v3 }
 0x491   :  { %v2180_v57 = vadd.f32 %v2179_v47, %v2137_v8 }
 0x493   :  { %v2223_v14 = vadd.f32 %v2222_v22, %v2180_v57  ;;  %v2702_v57 = vld [vmem:[%s4106_s3 + $0x138] sm:$0xff] }
 0x494   :  { %v2228_v23 = vpop.f32.mrf.mxu3 }
 0x495   :  { %v2091_v17 = vpop.f32.mrf.mxu0 }
 0x496   :  { %v2140_v51 = vpop.f32.mrf.mxu1  ;;  %v2184_v31 = vpop.f32.mrf.mxu2 }
 0x497   :  { %v2141_v6 = vadd.f32 %v2140_v51, %v2083_v63 }
 0x499   :  { %v2185_v20 = vadd.f32 %v2184_v31, %v2141_v6 }
 0x49b   :  { %v2229_v60 = vadd.f32 %v2228_v23, %v2185_v20 }
 0x49c   :  { %v2234_v32 = vpop.f32.mrf.mxu3 }
 0x49d   :  { %v2267_v36 = vpop.f32.mrf.mxu0 }
 0x49e   :  { %v2144_v42 = vpop.f32.mrf.mxu1  ;;  %v2268_v21 = vadd.f32 %v2267_v36, %v2217_v56  ;;  %v2189_v3 = vpop.f32.mrf.mxu2 }
 0x49f   :  { %v2145_v46 = vadd.f32 %v2144_v42, %v2091_v17 }
 0x4a1   :  { %v2190_v0 = vadd.f32 %v2189_v3, %v2145_v46 }
 0x4a3   :  { %v2235_v9 = vadd.f32 %v2234_v32, %v2190_v0 }
 0x4a5   :  { %v2271_v33 = vpop.f32.mrf.mxu0 }
 0x4a6   :  { %v2304_v24 = vpop.f32.mrf.mxu1  ;;  %v2272_v35 = vadd.f32 %v2271_v33, %v2223_v14  ;;  %v2700_v14 = vld [vmem:[%s4106_s3 + $0x128] sm:$0xff] }
 0x4a7   :  { %v2305_v7 = vadd.f32 %v2304_v24, %v2268_v21 }
 0x4a9   :  { %vm2319_vm9 = vcmp.ge.f32.partialorder %v2305_v7, 0.0  ;;  %v2323_v4 = vmul.f32 0.2, %v2305_v7 }
 0x4ab   :  { %v2327_v38 = vsel %vm2319_vm9, %v2305_v7, %v2323_v4  ;;  %v3981_v7 = vand.u32 4294901760, %v2702_v57  ;;  %v2701_v4 = vld [vmem:[%s4106_s3 + $0x130] sm:$0xff] }
 0x4ac   :  { %v2339_v18 = vsel %vm3950_vm13, %v2327_v38, 0.0  ;;  %v3989_v6 = vand.u32 4294901760, %v2701_v4 }
 0x4ad   :  { %v2352_v48 = vsel %vm389_vm10, %v2339_v18, 0  ;;  %v2275_v40 = vpop.f32.mrf.mxu0  ;;  %v3987_v54 = vsub.f32 %v2702_v57, %v3981_v7  ;;  %2720 = vmatpush.msra.mxu0 %v3981_v7  ;;  %v4001_v18 = vand.u32 4294901760, %v2700_v14 }
 0x4ae   :  { %v3957_v55 = vand.u32 4294901760, %v2352_v48  ;;  %v2308_v19 = vpop.f32.mrf.mxu1  ;;  %v2276_v45 = vadd.f32 %v2275_v40, %v2229_v60  ;;  %v3998_v31 = vsub.f32 %v2701_v4, %v3989_v6 }
 0x4af   :  { %v2309_v43 = vadd.f32 %v2308_v19, %v2272_v35  ;;  %v2762_v38 = vand.u32 4294901760, %v3987_v54  ;;  %v2699_v35 = vld [vmem:[%s4106_s3 + $0x120] sm:$0xff]  ;;  %2722 = vmatpush.msra.mxu0 %v3989_v6 }
 0x4b0   :  { %v2388_v30 = vsub.f32 %v2352_v48, %v3957_v55  ;;  %2477 = vmatmul.f32.vlgmr.msrb.gmra.mxu3 %v3957_v55  ;;  %v2768_v20 = vand.u32 4294901760, %v3998_v31  ;;  %v4020_v23 = vand.u32 4294901760, %v2699_v35 }
 0x4b1   :  { %vm2320_vm14 = vcmp.ge.f32.partialorder %v2309_v43, 0.0  ;;  %v2324_v26 = vmul.f32 0.2, %v2309_v43  ;;  %2869 = vmatpush.msrb.mxu3 %v3981_v7  ;;  %v2763_v19 = vsub.f32 %v3987_v54, %v2762_v38  ;;  %2724 = vmatpush.msra.mxu0 %v4001_v18 }
 0x4b2   :  { %2527 = vmatmul.f32.vlgmr.msrb.gmra.mxu0 %v2388_v30  ;;  %v2389_v11 = vand.u32 4294901760, %v2388_v30  ;;  %v4032_v46 = vsub.f32 %v2699_v35, %v4020_v23 }
 0x4b3   :  { %v2328_v61 = vsel %vm2320_vm14, %v2309_v43, %v2324_v26  ;;  %2871 = vmatpush.msrb.mxu3 %v3989_v6  ;;  %v4017_v43 = vsub.f32 %v2700_v14, %v4001_v18  ;;  %v2764_v40 = vand.u32 4294901760, %v2763_v19  ;;  %v2769_v26 = vsub.f32 %v3998_v31, %v2768_v20  ;;  %2726 = vmatpush.msra.mxu0 %v4020_v23 }
 0x4b4   :  { %v2340_v1 = vsel %vm3950_vm13, %v2328_v61, 0.0  ;;  %2573 = vmatmul.f32.vlgmr.msrb.gmra.mxu1 %v2389_v11  ;;  %v2390_v52 = vsub.f32 %v2388_v30, %v2389_v11  ;;  %v2698_v30 = vld [vmem:[%s4106_s3 + $0x118] sm:$0xff]  ;;  %v2697_v61 = vld [vmem:[%s4106_s3 + $0x110] sm:$0xff] }
 0x4b5   :  { %v2355_v41 = vsel %vm389_vm10, %v2340_v1, 0  ;;  %v2279_v16 = vpop.f32.mrf.mxu0  ;;  %2873 = vmatpush.msrb.mxu3 %v4001_v18  ;;  %v2774_v11 = vand.u32 4294901760, %v4017_v43  ;;  %v4036_v60 = vand.u32 4294901760, %v2698_v30  ;;  %2765 = vmatpush.msra.mxu1 %v2764_v40  ;;  %v2770_v1 = vand.u32 4294901760, %v2769_v26 }
 0x4b6   :  { %v2312_v27 = vpop.f32.mrf.mxu1  ;;  %v2391_v15 = vand.u32 4294901760, %v2390_v52  ;;  %v2395_v25 = vand.u32 4294901760, %v2355_v41  ;;  %v2280_v49 = vadd.f32 %v2279_v16, %v2235_v9 }
 0x4b7   :  { %v2313_v13 = vadd.f32 %v2312_v27, %v2276_v45  ;;  %2875 = vmatpush.msrb.mxu3 %v4020_v23  ;;  %v2775_v52 = vsub.f32 %v4017_v43, %v2774_v11  ;;  %v2780_v45 = vand.u32 4294901760, %v4032_v46  ;;  %v2785_v3 = vsub.f32 %v2698_v30, %v4036_v60  ;;  %v2696_v27 = vld [vmem:[%s4106_s3 + $0x108] sm:$0xff]  ;;  %2728 = vmatpush.msra.mxu0 %v4036_v60 }
 0x4b8   :  { %2392 = vmatmul.f32.vlgmr.msrb.gmra.mxu2 %v2391_v15  ;;  %2481 = vmatmul.f32.gmra.mxu3 %v2395_v25  ;;  %v2396_v12 = vsub.f32 %v2355_v41, %v2395_v25  ;;  %v4045_v41 = vand.u32 4294901760, %v2697_v61 }
 0x4b9   :  { %vm2321_vm15 = vcmp.ge.f32.partialorder %v2313_v13, 0.0  ;;  %v2325_v2 = vmul.f32 0.2, %v2313_v13  ;;  %2827 = vmatpush.msrb.mxu2 %v3987_v54  ;;  %2877 = vmatpush.msrb.mxu3 %v4036_v60  ;;  %v2776_v15 = vand.u32 4294901760, %v2775_v52 }
 0x4ba   :  { %2532 = vmatmul.f32.gmra.mxu0 %v2396_v12  ;;  %v2397_v34 = vand.u32 4294901760, %v2396_v12  ;;  %2771 = vmatpush.msra.mxu1 %v2770_v1  ;;  %v2791_v0 = vsub.f32 %v2697_v61, %v4045_v41 }
 0x4bb   :  { %v2329_v50 = vsel %vm2321_vm15, %v2313_v13, %v2325_v2  ;;  %2830 = vmatpush.msrb.mxu2 %v3998_v31  ;;  %v2731_v13 = vand.u32 4294901760, %v2696_v27  ;;  %v2695_v2 = vld [vmem:[%s4106_s3 + $0x100] sm:$0xff]  ;;  %2879 = vmatpush.msrb.mxu3 %v4045_v41 }
 0x4bc   :  { %v2341_v58 = vsel %vm24_vm11, %v2329_v50, 0.0  ;;  %2579 = vmatmul.f32.gmra.mxu1 %v2397_v34  ;;  %v2398_v62 = vsub.f32 %v2396_v12, %v2397_v34  ;;  %v2786_v12 = vand.u32 4294901760, %v2785_v3  ;;  %v2792_v34 = vand.u32 4294901760, %v2791_v0  ;;  %2730 = vmatpush.msra.mxu0 %v4045_v41 }
 0x4bd   :  { %v2358_v53 = vsel %vm389_vm10, %v2341_v58, 0  ;;  %2833 = vmatpush.msrb.mxu2 %v4017_v43  ;;  %2777 = vmatpush.msra.mxu1 %v2776_v15  ;;  %v2797_v9 = vsub.f32 %v2696_v27, %v2731_v13  ;;  %v2733_v50 = vand.u32 4294901760, %v2695_v2 }
 0x4be   :  { %v2316_v10 = vpop.f32.mrf.mxu1  ;;  %v2399_v63 = vand.u32 4294901760, %v2398_v62  ;;  %v2403_v28 = vand.u32 4294901760, %v2358_v53  ;;  %v2787_v58 = vsub.f32 %v2785_v3, %v2786_v12  ;;  %2881 = vmatpush.msrb.mxu3 %v2731_v13  ;;  %2732 = vmatpush.msra.mxu0 %v2731_v13 }
 0x4bf   :  { %v2317_v59 = vadd.f32 %v2316_v10, %v2280_v49  ;;  %2836 = vmatpush.msrb.mxu2 %v4032_v46  ;;  %v2793_v49 = vsub.f32 %v2791_v0, %v2792_v34  ;;  %v2803_v10 = vsub.f32 %v2695_v2, %v2733_v50 }
 0x4c0   :  { %2400 = vmatmul.f32.gmra.mxu2 %v2399_v63  ;;  %2485 = vmatmul.f32.gmra.mxu3 %v2403_v28  ;;  %v2404_v17 = vsub.f32 %v2358_v53, %v2403_v28  ;;  %v2798_v53 = vand.u32 4294901760, %v2797_v9  ;;  %v2788_v63 = vand.u32 4294901760, %v2787_v58  ;;  %v3056_v58 = vld [vmem:[%s4106_s3 + $0x158] ss:$0 sm:$0xff] }
 0x4c1   :  { %vm2322_vm0 = vcmp.ge.f32.partialorder %v2317_v59, 0.0  ;;  %v2326_v51 = vmul.f32 0.2, %v2317_v59  ;;  %2839 = vmatpush.msrb.mxu2 %v2785_v3  ;;  %2883 = vmatpush.msrb.mxu3 %v2733_v50 }
 0x4c2   :  { %2537 = vmatmul.f32.gmra.mxu0 %v2404_v17  ;;  %v2405_v37 = vand.u32 4294901760, %v2404_v17 }
 0x4c3   :  { %v2330_v29 = vsel %vm2322_vm0, %v2317_v59, %v2326_v51  ;;  %2842 = vmatpush.msrb.mxu2 %v2791_v0  ;;  %v2794_v59 = vand.u32 4294901760, %v2793_v49  ;;  %v2804_v51 = vand.u32 4294901760, %v2803_v10  ;;  %2734 = vmatpush.msra.mxu0 %v2733_v50 }
 0x4c4   :  { %v2342_v39 = vsel %vm24_vm11, %v2330_v29, 0.0  ;;  %2585 = vmatmul.f32.gmra.mxu1 %v2405_v37  ;;  %v2406_v36 = vsub.f32 %v2404_v17, %v2405_v37  ;;  %v2799_v17 = vsub.f32 %v2797_v9, %v2798_v53 }
 0x4c5   :  { %v2361_v42 = vsel %vm389_vm10, %v2342_v39, 0  ;;  %2845 = vmatpush.msrb.mxu2 %v2797_v9  ;;  %v2805_v29 = vsub.f32 %v2803_v10, %v2804_v51  ;;  %2908 = vmatpush.msrb.mxu0 %v2762_v38 }
 0x4c6   :  { %v2407_v5 = vand.u32 4294901760, %v2406_v36  ;;  %v2411_v47 = vand.u32 4294901760, %v2361_v42  ;;  %v2800_v37 = vand.u32 4294901760, %v2799_v17 }
 0x4c7   :  { %2848 = vmatpush.msrb.mxu2 %v2803_v10  ;;  %2912 = vmatpush.msrb.mxu0 %v2768_v20 }
 0x4c8   :  { %2408 = vmatmul.f32.gmra.mxu2 %v2407_v5  ;;  %2489 = vmatmul.f32.gmra.mxu3 %v2411_v47  ;;  %v2412_v8 = vsub.f32 %v2361_v42, %v2411_v47  ;;  %v2806_v42 = vand.u32 4294901760, %v2805_v29 }
 0x4c9   :  { %2916 = vmatpush.msrb.mxu0 %v2774_v11 }
 0x4ca   :  { %2542 = vmatmul.f32.gmra.mxu0 %v2412_v8  ;;  %v2413_v56 = vand.u32 4294901760, %v2412_v8 }
 0x4cb   :  { %2920 = vmatpush.msrb.mxu0 %v2780_v45 }
 0x4cc   :  { %2591 = vmatmul.f32.gmra.mxu1 %v2413_v56  ;;  %v2414_v22 = vsub.f32 %v2412_v8, %v2413_v56 }
 0x4cd   :  { %2924 = vmatpush.msrb.mxu0 %v2786_v12 }
 0x4ce   :  { %v2415_v21 = vand.u32 4294901760, %v2414_v22 }
 0x4cf   :  { %2928 = vmatpush.msrb.mxu0 %v2792_v34 }
 0x4d0   :  { %2416 = vmatmul.f32.gmra.mxu2 %v2415_v21  ;;  %2677 = vmatmul.f32.vlgmr.msra.gmra.mxu3 %v3957_v55 }
 0x4d1   :  { %2932 = vmatpush.msrb.mxu0 %v2798_v53 }
 0x4d3   :  { %2936 = vmatpush.msrb.mxu0 %v2804_v51 }
 0x4d8   :  { %2636 = vmatmul.f32.vlgmr.msra.gmra.mxu2 %v3957_v55  ;;  %2681 = vmatmul.f32.gmra.mxu3 %v2395_v25 }
 0x4e0   :  { %2640 = vmatmul.f32.gmra.mxu2 %v2395_v25  ;;  %2685 = vmatmul.f32.gmra.mxu3 %v2403_v28  ;;  %v2781_v25 = vsub.f32 %v4032_v46, %v2780_v45 }
 0x4e2   :  { %v2782_v16 = vand.u32 4294901760, %v2781_v25 }
 0x4e4   :  { %2783 = vmatpush.msra.mxu1 %v2782_v16 }
 0x4e6   :  { %2789 = vmatpush.msra.mxu1 %v2788_v63 }
 0x4e8   :  { %2644 = vmatmul.f32.gmra.mxu2 %v2403_v28  ;;  %2689 = vmatmul.f32.gmra.mxu3 %v2411_v47 }
 0x4e9   :  { %2795 = vmatpush.msra.mxu1 %v2794_v59 }
 0x4eb   :  { %2801 = vmatpush.msra.mxu1 %v2800_v37 }
 0x4ed   :  { %2807 = vmatpush.msra.mxu1 %v2806_v42 }
 0x4ef   :  { %2955 = vmatpush.msrb.mxu1 %v3981_v7 }
 0x4f0   :  { %2648 = vmatmul.f32.gmra.mxu2 %v2411_v47 }
 0x4f1   :  { %2957 = vmatpush.msrb.mxu1 %v3989_v6 }
 0x4f3   :  { %2959 = vmatpush.msrb.mxu1 %v4001_v18 }
 0x4f5   :  { %2961 = vmatpush.msrb.mxu1 %v4020_v23 }
 0x4f7   :  { %2963 = vmatpush.msrb.mxu1 %v4036_v60 }
 0x4f9   :  { %2965 = vmatpush.msrb.mxu1 %v4045_v41 }
 0x4fb   :  { %2967 = vmatpush.msrb.mxu1 %v2731_v13 }
 0x4fd   :  { %2969 = vmatpush.msrb.mxu1 %v2733_v50 }
 0x52f   :  { %v2528_v28 = vpop.f32.mrf.mxu0 }
 0x531   :  { %v2574_v39 = vpop.f32.mrf.mxu1 }
 0x533   :  { %v3972_v44 = vpop.f32.mrf.mxu3 }
 0x537   :  { %v2533_v47 = vpop.f32.mrf.mxu0 }
 0x539   :  { %v2580_v56 = vpop.f32.mrf.mxu1 }
 0x53b   :  { %v3974_v33 = vpop.f32.mrf.mxu2  ;;  %v3976_v24 = vpop.f32.mrf.mxu3 }
 0x53c   :  { %v2479_v22 = vadd.f32 %v3972_v44, %v3974_v33 }
 0x53e   :  { %v2529_v54 = vadd.f32 %v2528_v28, %v2479_v22 }
 0x53f   :  { %v2538_v7 = vpop.f32.mrf.mxu0 }
 0x540   :  { %v2575_v31 = vadd.f32 %v2574_v39, %v2529_v54 }
 0x541   :  { %v2586_v14 = vpop.f32.mrf.mxu1 }
 0x543   :  { %v4008_v48 = vpop.f32.mrf.mxu2  ;;  %v4010_v55 = vpop.f32.mrf.mxu3 }
 0x544   :  { %v2483_v38 = vadd.f32 %v3976_v24, %v4008_v48 }
 0x546   :  { %v2534_v20 = vadd.f32 %v2533_v47, %v2483_v38 }
 0x547   :  { %v2543_v23 = vpop.f32.mrf.mxu0 }
 0x548   :  { %v2581_v26 = vadd.f32 %v2580_v56, %v2534_v20 }
 0x549   :  { %v2592_v46 = vpop.f32.mrf.mxu1 }
 0x54b   :  { %v2409_v32 = vpop.f32.mrf.mxu2  ;;  %v2490_v62 = vpop.f32.mrf.mxu3 }
 0x54c   :  { %v2487_v57 = vadd.f32 %v4010_v55, %v2409_v32 }
 0x54e   :  { %v2539_v6 = vadd.f32 %v2538_v7, %v2487_v57 }
 0x550   :  { %v2587_v19 = vadd.f32 %v2586_v14, %v2539_v6 }
 0x553   :  { %v2417_v36 = vpop.f32.mrf.mxu2  ;;  %v2678_v5 = vpop.f32.mrf.mxu3 }
 0x554   :  { %v2491_v18 = vadd.f32 %v2490_v62, %v2417_v36 }
 0x556   :  { %v2544_v55 = vadd.f32 %v2543_v23, %v2491_v18  ;;  %v3061_v18 = vmov 0  }
 0x557   :  { %3048 = vset.pattern.permute.xlu1 %v3061_v18  ;;  %3049 = vset.pattern.permute.xlu0 %v3061_v18 }
 0x558   :  { %v2593_v1 = vadd.f32 %v2592_v46, %v2544_v55 }
 0x55b   :  { %v2637_v8 = vpop.f32.mrf.mxu2  ;;  %v2682_v21 = vpop.f32.mrf.mxu3 }
 0x55c   :  { %v2638_v35 = vadd.f32 %v2637_v8, %v2575_v31 }
 0x55e   :  { %v2679_v30 = vadd.f32 %v2678_v5, %v2638_v35  ;;  %v3057_v5 = vld [vmem:[%s4106_s3 + $0x160] ss:$0 sm:$0xff]  ;;  %v3058_v35 = vld [vmem:[%s4106_s3 + $0x168] ss:$0 sm:$0xff] }
 0x563   :  { %v2641_v4 = vpop.f32.mrf.mxu2  ;;  %v2686_v44 = vpop.f32.mrf.mxu3 }
 0x564   :  { %v2642_v60 = vadd.f32 %v2641_v4, %v2581_v26 }
 0x566   :  { %v2683_v3 = vadd.f32 %v2682_v21, %v2642_v60 }
 0x56b   :  { %v2645_v33 = vpop.f32.mrf.mxu2  ;;  %v2690_v41 = vpop.f32.mrf.mxu3 }
 0x56c   :  { %v2646_v43 = vadd.f32 %v2645_v33, %v2587_v19 }
 0x56e   :  { %v2687_v40 = vadd.f32 %v2686_v44, %v2646_v43 }
 0x570   :  { %v2693_v11 = vadd.f32 %v2687_v40, %v2679_v30 }
 0x572   :  { %v2706_v61 = vsel %vm389_vm10, %v2693_v11, 0 }
 0x573   :  { %v2735_v24 = vand.u32 4294901760, %v2706_v61  ;;  %v2649_v48 = vpop.f32.mrf.mxu2 }
 0x574   :  { %v2650_v52 = vadd.f32 %v2649_v48, %v2593_v1 }
 0x575   :  { %v2736_v45 = vsub.f32 %v2706_v61, %v2735_v24  ;;  %2809 = vmatmul.f32.vlgmr.msra.gmra.mxu1 %v2735_v24 }
 0x576   :  { %v2691_v27 = vadd.f32 %v2690_v41, %v2650_v52 }
 0x577   :  { %v2737_v15 = vand.u32 4294901760, %v2736_v45  ;;  %2851 = vmatmul.f32.vlgmr.msrb.gmra.mxu2 %v2736_v45 }
 0x578   :  { %v2694_v25 = vadd.f32 %v2691_v27, %v2683_v3 }
 0x579   :  { %v2738_v0 = vsub.f32 %v2736_v45, %v2737_v15  ;;  %2887 = vmatmul.f32.vlgmr.msrb.gmra.mxu3 %v2737_v15 }
 0x57a   :  { %v2709_v13 = vsel %vm389_vm10, %v2694_v25, 0 }
 0x57b   :  { %v2739_v12 = vand.u32 4294901760, %v2738_v0  ;;  %v2743_v2 = vand.u32 4294901760, %v2709_v13 }
 0x57d   :  { %2740 = vmatmul.f32.vlgmr.msra.gmra.mxu0 %v2739_v12  ;;  %2813 = vmatmul.f32.gmra.mxu1 %v2743_v2  ;;  %v2744_v32 = vsub.f32 %v2709_v13, %v2743_v2 }
 0x57f   :  { %2856 = vmatmul.f32.gmra.mxu2 %v2744_v32  ;;  %v2745_v16 = vand.u32 4294901760, %v2744_v32 }
 0x581   :  { %2893 = vmatmul.f32.gmra.mxu3 %v2745_v16  ;;  %v2746_v34 = vsub.f32 %v2744_v32, %v2745_v16 }
 0x583   :  { %v2747_v9 = vand.u32 4294901760, %v2746_v34 }
 0x585   :  { %2748 = vmatmul.f32.gmra.mxu0 %v2747_v9  ;;  %2971 = vmatmul.f32.vlgmr.msrb.gmra.mxu1 %v2735_v24 }
 0x58d   :  { %2938 = vmatmul.f32.vlgmr.msrb.gmra.mxu0 %v2735_v24  ;;  %2975 = vmatmul.f32.gmra.mxu1 %v2743_v2 }
 0x595   :  { %2942 = vmatmul.f32.gmra.mxu0 %v2743_v2 }
 0x5f2   :  { %v2810_v50 = vpop.f32.mrf.mxu1 }
 0x5fa   :  { %v2741_v62 = vpop.f32.mrf.mxu0  ;;  %v2814_v53 = vpop.f32.mrf.mxu1 }
 0x5fb   :  { %v2742_v49 = vadd.f32 %v3056_v58, %v2741_v62  ;;  %v2852_v63 = vpop.f32.mrf.mxu2 }
 0x5fc   :  { %v2888_v51 = vpop.f32.mrf.mxu3 }
 0x5fd   :  { %v2811_v10 = vadd.f32 %v2810_v50, %v2742_v49 }
 0x5ff   :  { %v2853_v59 = vadd.f32 %v2852_v63, %v2811_v10 }
 0x601   :  { %v2889_v37 = vadd.f32 %v2888_v51, %v2853_v59 }
 0x602   :  { %v2749_v28 = vpop.f32.mrf.mxu0  ;;  %v2972_v39 = vpop.f32.mrf.mxu1 }
 0x603   :  { %v2750_v17 = vadd.f32 %v3056_v58, %v2749_v28  ;;  %v2857_v47 = vpop.f32.mrf.mxu2 }
 0x604   :  { %v2894_v21 = vpop.f32.mrf.mxu3 }
 0x605   :  { %v2815_v29 = vadd.f32 %v2814_v53, %v2750_v17 }
 0x607   :  { %v2858_v8 = vadd.f32 %v2857_v47, %v2815_v29 }
 0x609   :  { %v2895_v57 = vadd.f32 %v2894_v21, %v2858_v8 }
 0x60a   :  { %v2939_v36 = vpop.f32.mrf.mxu0  ;;  %v2976_v6 = vpop.f32.mrf.mxu1 }
 0x60b   :  { %v2940_v42 = vadd.f32 %v2939_v36, %v2889_v37 }
 0x60d   :  { %v2973_v56 = vadd.f32 %v2972_v39, %v2940_v42 }
 0x60f   :  { %v2982_v22 = vmul.f32 %v3057_v5, %v2973_v56  ;;  %2999 = vst.msk [vmem:[%s4108_s4] sm:$0xff] %vm389_vm10, %v2973_v56 }
 0x611   :  { %v2984_v7 = vsel %vm389_vm10, %v2982_v22, 0.0 }
 0x612   :  { %v2943_v4 = vpop.f32.mrf.mxu0  ;;  %2985 = vadd.xlane.f32.xlu0 %v2984_v7 }
 0x613   :  { %v2944_v54 = vadd.f32 %v2943_v4, %v2895_v57 }
 0x615   :  { %v2977_v14 = vadd.f32 %v2976_v6, %v2944_v54 }
 0x617   :  { %v2983_v38 = vmul.f32 %v3057_v5, %v2977_v14  ;;  %3000 = vst.msk [vmem:[%s4108_s4 + $0x8] sm:$0xff] %vm389_vm10, %v2977_v14 }
 0x619   :  { %v2987_v31 = vsel %vm389_vm10, %v2983_v38, 0.0 }
 0x61a   :  { %2988 = vadd.xlane.f32.xlu0 %v2987_v31 }
 0x685   :  { %v2986_v19 = vpop.xlane.xlu0 %2985 }
 0x686   :  { %v2991_v44 = vadd.f32 %v3058_v35, %v2986_v19 }
 0x688   :  { %vm2993_vm11 = vcmp.ge.f32.partialorder %v2991_v44, 0.0  ;;  %v2995_v33 = vmul.f32 0.2, %v2991_v44 }
 0x68a   :  { %v2997_v20 = vsel %vm2993_vm11, %v2991_v44, %v2995_v33 }
 0x68b   :  { %3003 = vperm.xlu1 %3048, %v2997_v20  }
 0x68d   :  { %v2989_v43 = vpop.xlane.xlu0 %2988 }
 0x68e   :  { %v2992_v23 = vadd.f32 %v3058_v35, %v2989_v43 }
 0x690   :  { %v2996_v55 = vmul.f32 0.2, %v2992_v23  ;;  %vm2994_vm1 = vcmp.ge.f32.partialorder %v2992_v23, 0.0 }
 0x692   :  { %v2998_v30 = vsel %vm2994_vm1, %v2992_v23, %v2996_v55 }
 0x693   :  { %3008 = vperm.xlu1 %3048, %v2998_v30  }
 0x6fd   :  { %v3004_v40 = vpop.permute.xlu1 %3003 }
 0x6fe   :  { %3011 = vst.msk [vmem:[%s4108_s4 + $0x10] sm:$0xff] %vm389_vm10, %v3004_v40 }
 0x705   :  { %v3009_v26 = vpop.permute.xlu1 %3008 }
 0x706   :  { %3012 = vst.msk [vmem:[%s4108_s4 + $0x18] sm:$0xff] %vm389_vm10, %v3009_v26 }

</bundles_post_ra>
